<compile_context>
chip_gen: v6e
topology: v6e:2x2x1
jax: 0.10.0
libtpu: 0.0.40
codegen_flags: <defaults>
</compile_context>

<pallas_src>
import functools

import jax
import jax.numpy as jnp
from jax.experimental import pallas as pl
from jax.experimental.pallas import tpu as pltpu


def _round_up(x: int, m: int) -> int:
    return ((x + m - 1) // m) * m


def _vmem_capacity_bytes() -> int:
    try:
        return int(pltpu.get_tpu_info().vmem_capacity_bytes)
    except Exception:  # pragma: no cover - conservative fallback (v7x per-TC size)
        return 64 << 20


def gcp_kernel(s_ref, v_ref, fr_ref,
               wvd_ref, wvdf_ref,
               wzs_ref, wzv_ref, wzsh_ref, bz_ref,
               wg_ref, bg_ref, wu_ref,
               out_ref):
    f32 = jnp.float32
    bf16 = jnp.bfloat16

    v0 = v_ref[0]                                                       # [TE, VI] bf16
    v1 = v_ref[1]
    v2 = v_ref[2]

    # ---- vector_down per spatial plane (bf16 MXU, f32 accumulate) ----
    vh0 = jnp.dot(v0, wvd_ref[...], preferred_element_type=f32)        # [TE, H]
    vh1 = jnp.dot(v1, wvd_ref[...], preferred_element_type=f32)
    vh2 = jnp.dot(v2, wvd_ref[...], preferred_element_type=f32)

    # safe_norm over the spatial axis
    vnorm = jnp.sqrt(vh0 * vh0 + vh1 * vh1 + vh2 * vh2 + 1e-8)          # [TE, H] f32

    # ---- vector_down_frames, column-expanded: vdf_k[:, 3a+b] = (v_k @ wvdf)[:, a] ----
    vdf0 = jnp.dot(v0, wvdf_ref[...], preferred_element_type=f32)       # [TE, 9]
    vdf1 = jnp.dot(v1, wvdf_ref[...], preferred_element_type=f32)
    vdf2 = jnp.dot(v2, wvdf_ref[...], preferred_element_type=f32)

    # ---- scalarize as 3 full-width FMAs on a 9-lane tensor ----
    # fr_ref[k][:, 3a+b] = frames[:, b, k]  =>  sh[:, 3a+b] = sum_k frames[:, b, k] * vdf_k[:, a]
    sh = (fr_ref[0].astype(f32) * vdf0
          + fr_ref[1].astype(f32) * vdf1
          + fr_ref[2].astype(f32) * vdf2)                               # [TE, 9] f32

    # ---- scalar_out linear, concat-free (zero-padded row blocks of wso) ----
    # W = SO + 3*VO ; columns >= SO of z are exactly 0 by construction of the padded weights.
    z = (jnp.dot(s_ref[...], wzs_ref[...], preferred_element_type=f32)
         + jnp.dot(vnorm.astype(bf16), wzv_ref[...], preferred_element_type=f32)
         + jnp.dot(sh, wzsh_ref[...], preferred_element_type=f32)       # tiny f32 dot (9-deep)
         + bz_ref[...])                                                 # [TE, W]
    a = z * jax.nn.sigmoid(z)                                           # silu; cols >= SO stay 0

    # ---- vector gate: wg tiled so the gate lands at slab cols SO + k*VO + o ----
    gate = jnp.dot(a.astype(bf16), wg_ref[...], preferred_element_type=f32) + bg_ref[...]

    # ---- vector_up: wu[k] places plane k's result at slab cols SO + k*VO (cols < SO are 0) ----
    vup = (jnp.dot(vh0.astype(bf16), wu_ref[0], preferred_element_type=f32)
           + jnp.dot(vh1.astype(bf16), wu_ref[1], preferred_element_type=f32)
           + jnp.dot(vh2.astype(bf16), wu_ref[2], preferred_element_type=f32))   # [TE, W]

    # Lane-dense slab: cols [0:SO] = silu(z), cols [SO + k*VO + o] = vup_k * sigmoid(gate)
    out_ref[...] = (a + vup * jax.nn.sigmoid(gate)).astype(out_ref.dtype)


def gcp_forward(scalar_rep, vector_rep, edge_index, frames, params, *, tile_e=None):
    """Pallas GCP forward.

    scalar_rep : [E, SI]  float32
    vector_rep : [E, VI, 3] float32   (PyTorch layout)
    edge_index : [2, E] int32  -- unused for node_inputs=False / node_mask=None
    frames     : [E, 3, 3] float32
    returns (scalar_out [E, SO], vector_out [E, VO, 3])
    """
    del edge_index  # not needed in this configuration (see header comment)
    f32, bf16 = jnp.float32, jnp.bfloat16
    E, SI = scalar_rep.shape
    VI = vector_rep.shape[1]
    H = params["wvd"].shape[1]
    SO = params["wso"].shape[1]
    VO = params["wvu"].shape[1]
    W = SO + 3 * VO            # lane-dense output slab width

    # ---- per-generation tile / VMEM budget ----
    vmem_cap = _vmem_capacity_bytes()
    if tile_e is None:
        # v7x (64 MiB VMEM/TC) -> smaller default tile; v5e/v6e (128 MiB) -> bigger. Sweep 256-2048.
        tile_e = 512 if vmem_cap <= (64 << 20) else 1024
    vmem_limit = int(min(100 << 20, (vmem_cap * 3) // 4))

    if E <= 16:
        TE = E                                     # single full block (tiny problems)
    elif E <= int(tile_e):
        TE = _round_up(-(-E // 2), 8)              # split so grid >= 2 (v7x dual-TC sharding)
    else:
        TE = _round_up(min(int(tile_e), E), 8)
    grid = (pl.cdiv(E, TE),)                       # ragged last block allowed; writes are masked

    # ---- layout plumbing (plain JAX); all E-scaled streams cast to bf16 ----
    s_in = scalar_rep.astype(bf16)                                    # [E, SI]
    v_sp = jnp.transpose(vector_rep, (2, 0, 1)).astype(bf16)          # [3, E, VI]
    # fr[k, e, 3a+b] = frames[e, b, k]  (compact: only the 9 real columns, no zero padding)
    fr = jnp.tile(jnp.transpose(frames, (2, 0, 1)), (1, 1, 3)).astype(bf16)   # [3, E, 9]

    # ---- weight packing (all padding lives here, not in the kernel) ----
    wso = params["wso"].astype(f32)
    bso = params["bso"].astype(f32)
    wvu = params["wvu"].astype(f32)
    wvos = params["wvos"].astype(f32)
    bvos = params["bvos"].astype(f32)

    wvd = params["wvd"].astype(bf16)                                   # [VI, H]
    wvdf9 = jnp.repeat(params["wvdf"], 3, axis=1).astype(bf16)         # [VI, 9]; col 3a+b = wvdf[:, a]

    # scalar_out split into zero-padded row blocks, each mapped to slab cols [0:SO]
    wzs = jnp.zeros((SI, W), f32).at[:, :SO].set(wso[:SI]).astype(bf16)
    wzv = jnp.zeros((H, W), f32).at[:, :SO].set(wso[SI:SI + H]).astype(bf16)
    wzsh = jnp.zeros((9, W), f32).at[:, :SO].set(wso[SI + H:])         # tiny, kept f32
    bz = jnp.zeros((1, W), f32).at[:, :SO].set(bso)

    # vector_out_scale tiled so the gate lands at slab cols SO + k*VO + o
    wg = jnp.zeros((W, W), f32).at[:SO, SO:].set(jnp.tile(wvos, (1, 3))).astype(bf16)
    bg = jnp.zeros((1, W), f32).at[:, SO:].set(jnp.tile(bvos, (1, 3)))

    # vector_up per spatial plane, placed at slab cols SO + k*VO
    wu = jnp.zeros((3, H, W), f32)
    for k in range(3):
        wu = wu.at[k, :, SO + k * VO:SO + (k + 1) * VO].set(wvu)
    wu = wu.astype(bf16)

    slab = pl.pallas_call(
        gcp_kernel,
        out_shape=jax.ShapeDtypeStruct((E, W), f32),
        grid=grid,
        in_specs=[
            pl.BlockSpec((TE, SI), lambda i: (i, 0)),
            pl.BlockSpec((3, TE, VI), lambda i: (0, i, 0)),
            pl.BlockSpec((3, TE, 9), lambda i: (0, i, 0)),
            pl.BlockSpec((VI, H), lambda i: (0, 0)),
            pl.BlockSpec((VI, 9), lambda i: (0, 0)),
            pl.BlockSpec((SI, W), lambda i: (0, 0)),
            pl.BlockSpec((H, W), lambda i: (0, 0)),
            pl.BlockSpec((9, W), lambda i: (0, 0)),
            pl.BlockSpec((1, W), lambda i: (0, 0)),
            pl.BlockSpec((W, W), lambda i: (0, 0)),
            pl.BlockSpec((1, W), lambda i: (0, 0)),
            pl.BlockSpec((3, H, W), lambda i: (0, 0, 0)),
        ],
        out_specs=pl.BlockSpec((TE, W), lambda i: (i, 0)),
        compiler_params=pltpu.CompilerParams(
            dimension_semantics=("parallel",),
            vmem_limit_bytes=vmem_limit),
    )(s_in, v_sp, fr, wvd, wvdf9, wzs, wzv, wzsh, bz, wg, bg, wu)

    s_out = slab[:, :SO]
    v_out = jnp.transpose(slab[:, SO:].reshape(E, 3, VO), (0, 2, 1))   # [E, VO, 3]
    return s_out, v_out


def gcp_reference(scalar_rep, vector_rep, frames, params):
    """Pure-JAX f32 reference mirroring the PyTorch forward (default config)."""
    v_pre = jnp.swapaxes(vector_rep, -1, -2)                    # [E, 3, VI]
    vh = v_pre @ params["wvd"]                                   # [E, 3, H]
    vnorm = jnp.sqrt(jnp.sum(vh * vh, axis=-2) + 1e-8)           # [E, H]
    vdf = v_pre @ params["wvdf"]                                 # [E, 3, 3]
    local = jnp.einsum("ebk,eka->eba", frames, vdf)              # [E, 3, 3]
    sh = jnp.swapaxes(local, -1, -2).reshape(vdf.shape[0], 9)    # [E, 9]
    merged = jnp.concatenate([scalar_rep, vnorm, sh], axis=-1)
    z = merged @ params["wso"] + params["bso"]                   # [E, SO]
    vu = jnp.swapaxes(vh @ params["wvu"], -1, -2)                # [E, VO, 3]
    gate = jax.nn.silu(z) @ params["wvos"] + params["bvos"]      # [E, VO]
    vout = vu * jax.nn.sigmoid(gate)[..., None]
    return jax.nn.silu(z), vout


def init_params(key, si, vi, so, vo):
    h = max(vi, vo)  # bottleneck = 1
    ks = jax.random.split(key, 7)
    scale = 0.1
    return {
        # nn.Linear weights stored pre-transposed as [in, out]
        "wvd": scale * jax.random.normal(ks[0], (vi, h), jnp.float32),
        "wvdf": scale * jax.random.normal(ks[1], (vi, 3), jnp.float32),
        "wso": scale * jax.random.normal(ks[2], (si + h + 9, so), jnp.float32),
        "bso": scale * jax.random.normal(ks[3], (1, so), jnp.float32),
        "wvu": scale * jax.random.normal(ks[4], (h, vo), jnp.float32),
        "wvos": scale * jax.random.normal(ks[5], (so, vo), jnp.float32),
        "bvos": scale * jax.random.normal(ks[6], (1, vo), jnp.float32),
    }


if __name__ == "__main__":
    # E deliberately NOT a multiple of the tile to exercise the ragged-tail grid path.
    E, SI, VI, SO, VO = 200, 16, 8, 16, 8
    key = jax.random.PRNGKey(0)
    k1, k2, k3, k4, kp = jax.random.split(key, 5)

    scalar_rep = jax.random.normal(k1, (E, SI), jnp.float32)
    vector_rep = jax.random.normal(k2, (E, VI, 3), jnp.float32)
    frames = jax.random.normal(k3, (E, 3, 3), jnp.float32)
    edge_index = jax.random.randint(k4, (2, E), 0, E, jnp.int32)  # unused in this config

    params = init_params(kp, SI, VI, SO, VO)

    # small tile for the small demo; production default is auto (1024 v5e/v6e, 512 v7x)
    run = jax.jit(functools.partial(gcp_forward, tile_e=128))
    s_out, v_out = run(scalar_rep, vector_rep, edge_index, frames, params)
    jax.block_until_ready((s_out, v_out))

    s_ref, v_ref = gcp_reference(scalar_rep, vector_rep, frames, params)
    assert s_out.shape == (E, SO) and v_out.shape == (E, VO, 3)
    # bf16 MXU operands -> tolerances loosened vs the all-f32 reference
    assert jnp.allclose(s_out, s_ref, rtol=2e-2, atol=1e-2), float(jnp.max(jnp.abs(s_out - s_ref)))
    assert jnp.allclose(v_out, v_ref, rtol=2e-2, atol=1e-2), float(jnp.max(jnp.abs(v_out - v_ref)))

    print("KERNEL_OK")
</pallas_src>

<mosaic_0001>
module attributes {stable_mosaic.version = 11 : i64} {
  func.func @gcp_kernel(%arg0: i32, %arg1: memref<128x16xbf16, #tpu.memory_space<vmem>>, %arg2: memref<3x128x8xbf16, #tpu.memory_space<vmem>>, %arg3: memref<3x128x9xbf16, #tpu.memory_space<vmem>>, %arg4: memref<8x8xbf16, #tpu.memory_space<vmem>>, %arg5: memref<8x9xbf16, #tpu.memory_space<vmem>>, %arg6: memref<16x40xbf16, #tpu.memory_space<vmem>>, %arg7: memref<8x40xbf16, #tpu.memory_space<vmem>>, %arg8: memref<9x40xf32, #tpu.memory_space<vmem>>, %arg9: memref<1x40xf32, #tpu.memory_space<vmem>>, %arg10: memref<40x40xbf16, #tpu.memory_space<vmem>>, %arg11: memref<1x40xf32, #tpu.memory_space<vmem>>, %arg12: memref<3x8x40xbf16, #tpu.memory_space<vmem>>, %arg13: memref<128x40xf32, #tpu.memory_space<vmem>>) attributes {dimension_semantics = [#tpu.dimension_semantics<parallel>], iteration_bounds = array<i64: 2>, scalar_prefetch = 0 : i64, scratch_operands = 0 : i64, tpu.core_type = #tpu.core_type<tc>, window_params = [{transform_indices = @transform_0, window_bounds = array<i64: 128, 16>}, {transform_indices = @transform_1, window_bounds = array<i64: 3, 128, 8>}, {transform_indices = @transform_2, window_bounds = array<i64: 3, 128, 9>}, {pipeline_mode = #tpu.pipeline_mode<synchronous>, transform_indices = @transform_3, window_bounds = array<i64: 8, 8>}, {pipeline_mode = #tpu.pipeline_mode<synchronous>, transform_indices = @transform_4, window_bounds = array<i64: 8, 9>}, {pipeline_mode = #tpu.pipeline_mode<synchronous>, transform_indices = @transform_5, window_bounds = array<i64: 16, 40>}, {pipeline_mode = #tpu.pipeline_mode<synchronous>, transform_indices = @transform_6, window_bounds = array<i64: 8, 40>}, {pipeline_mode = #tpu.pipeline_mode<synchronous>, transform_indices = @transform_7, window_bounds = array<i64: 9, 40>}, {pipeline_mode = #tpu.pipeline_mode<synchronous>, transform_indices = @transform_8, window_bounds = array<i64: 1, 40>}, {pipeline_mode = #tpu.pipeline_mode<synchronous>, transform_indices = @transform_9, window_bounds = array<i64: 40, 40>}, {pipeline_mode = #tpu.pipeline_mode<synchronous>, transform_indices = @transform_10, window_bounds = array<i64: 1, 40>}, {pipeline_mode = #tpu.pipeline_mode<synchronous>, transform_indices = @transform_11, window_bounds = array<i64: 3, 8, 40>}, {transform_indices = @transform_12, window_bounds = array<i64: 128, 40>}]} {
    %c0 = arith.constant 0 : index
    %c0_0 = arith.constant 0 : index
    %c0_1 = arith.constant 0 : index
    %0 = vector.load %arg2[%c0, %c0_0, %c0_1] : memref<3x128x8xbf16, #tpu.memory_space<vmem>>, vector<1x128x8xbf16>
    %1 = vector.shape_cast %0 : vector<1x128x8xbf16> to vector<128x8xbf16>
    %c1 = arith.constant 1 : index
    %c0_2 = arith.constant 0 : index
    %c0_3 = arith.constant 0 : index
    %2 = vector.load %arg2[%c1, %c0_2, %c0_3] : memref<3x128x8xbf16, #tpu.memory_space<vmem>>, vector<1x128x8xbf16>
    %3 = vector.shape_cast %2 : vector<1x128x8xbf16> to vector<128x8xbf16>
    %c2 = arith.constant 2 : index
    %c0_4 = arith.constant 0 : index
    %c0_5 = arith.constant 0 : index
    %4 = vector.load %arg2[%c2, %c0_4, %c0_5] : memref<3x128x8xbf16, #tpu.memory_space<vmem>>, vector<1x128x8xbf16>
    %5 = vector.shape_cast %4 : vector<1x128x8xbf16> to vector<128x8xbf16>
    %c0_6 = arith.constant 0 : index
    %c0_7 = arith.constant 0 : index
    %6 = vector.load %arg4[%c0_6, %c0_7] : memref<8x8xbf16, #tpu.memory_space<vmem>>, vector<8x8xbf16>
    %cst = arith.constant dense<0.000000e+00> : vector<128x8xf32>
    %7 = tpu.matmul %1, %6, %cst {dimension_numbers = #tpu.dot_dimension_numbers<[1], [0], [0], [1], [0, 0, 1, 1], [], []>} : vector<128x8xbf16>, vector<8x8xbf16>, vector<128x8xf32> -> vector<128x8xf32>
    %c0_8 = arith.constant 0 : index
    %c0_9 = arith.constant 0 : index
    %8 = vector.load %arg4[%c0_8, %c0_9] : memref<8x8xbf16, #tpu.memory_space<vmem>>, vector<8x8xbf16>
    %cst_10 = arith.constant dense<0.000000e+00> : vector<128x8xf32>
    %9 = tpu.matmul %3, %8, %cst_10 {dimension_numbers = #tpu.dot_dimension_numbers<[1], [0], [0], [1], [0, 0, 1, 1], [], []>} : vector<128x8xbf16>, vector<8x8xbf16>, vector<128x8xf32> -> vector<128x8xf32>
    %c0_11 = arith.constant 0 : index
    %c0_12 = arith.constant 0 : index
    %10 = vector.load %arg4[%c0_11, %c0_12] : memref<8x8xbf16, #tpu.memory_space<vmem>>, vector<8x8xbf16>
    %cst_13 = arith.constant dense<0.000000e+00> : vector<128x8xf32>
    %11 = tpu.matmul %5, %10, %cst_13 {dimension_numbers = #tpu.dot_dimension_numbers<[1], [0], [0], [1], [0, 0, 1, 1], [], []>} : vector<128x8xbf16>, vector<8x8xbf16>, vector<128x8xf32> -> vector<128x8xf32>
    %12 = arith.mulf %7, %7 : vector<128x8xf32>
    %13 = arith.mulf %9, %9 : vector<128x8xf32>
    %14 = arith.addf %12, %13 : vector<128x8xf32>
    %15 = arith.mulf %11, %11 : vector<128x8xf32>
    %16 = arith.addf %14, %15 : vector<128x8xf32>
    %cst_14 = arith.constant 9.99999993E-9 : f32
    %17 = vector.broadcast %cst_14 : f32 to vector<128x8xf32>
    %18 = arith.addf %16, %17 : vector<128x8xf32>
    %19 = math.sqrt %18 : vector<128x8xf32>
    %c0_15 = arith.constant 0 : index
    %c0_16 = arith.constant 0 : index
    %20 = vector.load %arg5[%c0_15, %c0_16] : memref<8x9xbf16, #tpu.memory_space<vmem>>, vector<8x9xbf16>
    %cst_17 = arith.constant dense<0.000000e+00> : vector<128x9xf32>
    %21 = tpu.matmul %1, %20, %cst_17 {dimension_numbers = #tpu.dot_dimension_numbers<[1], [0], [0], [1], [0, 0, 1, 1], [], []>} : vector<128x8xbf16>, vector<8x9xbf16>, vector<128x9xf32> -> vector<128x9xf32>
    %c0_18 = arith.constant 0 : index
    %c0_19 = arith.constant 0 : index
    %22 = vector.load %arg5[%c0_18, %c0_19] : memref<8x9xbf16, #tpu.memory_space<vmem>>, vector<8x9xbf16>
    %cst_20 = arith.constant dense<0.000000e+00> : vector<128x9xf32>
    %23 = tpu.matmul %3, %22, %cst_20 {dimension_numbers = #tpu.dot_dimension_numbers<[1], [0], [0], [1], [0, 0, 1, 1], [], []>} : vector<128x8xbf16>, vector<8x9xbf16>, vector<128x9xf32> -> vector<128x9xf32>
    %c0_21 = arith.constant 0 : index
    %c0_22 = arith.constant 0 : index
    %24 = vector.load %arg5[%c0_21, %c0_22] : memref<8x9xbf16, #tpu.memory_space<vmem>>, vector<8x9xbf16>
    %cst_23 = arith.constant dense<0.000000e+00> : vector<128x9xf32>
    %25 = tpu.matmul %5, %24, %cst_23 {dimension_numbers = #tpu.dot_dimension_numbers<[1], [0], [0], [1], [0, 0, 1, 1], [], []>} : vector<128x8xbf16>, vector<8x9xbf16>, vector<128x9xf32> -> vector<128x9xf32>
    %c0_24 = arith.constant 0 : index
    %c0_25 = arith.constant 0 : index
    %c0_26 = arith.constant 0 : index
    %26 = vector.load %arg3[%c0_24, %c0_25, %c0_26] : memref<3x128x9xbf16, #tpu.memory_space<vmem>>, vector<1x128x9xbf16>
    %27 = vector.shape_cast %26 : vector<1x128x9xbf16> to vector<128x9xbf16>
    %28 = arith.extf %27 : vector<128x9xbf16> to vector<128x9xf32>
    %29 = arith.mulf %28, %21 : vector<128x9xf32>
    %c1_27 = arith.constant 1 : index
    %c0_28 = arith.constant 0 : index
    %c0_29 = arith.constant 0 : index
    %30 = vector.load %arg3[%c1_27, %c0_28, %c0_29] : memref<3x128x9xbf16, #tpu.memory_space<vmem>>, vector<1x128x9xbf16>
    %31 = vector.shape_cast %30 : vector<1x128x9xbf16> to vector<128x9xbf16>
    %32 = arith.extf %31 : vector<128x9xbf16> to vector<128x9xf32>
    %33 = arith.mulf %32, %23 : vector<128x9xf32>
    %34 = arith.addf %29, %33 : vector<128x9xf32>
    %c2_30 = arith.constant 2 : index
    %c0_31 = arith.constant 0 : index
    %c0_32 = arith.constant 0 : index
    %35 = vector.load %arg3[%c2_30, %c0_31, %c0_32] : memref<3x128x9xbf16, #tpu.memory_space<vmem>>, vector<1x128x9xbf16>
    %36 = vector.shape_cast %35 : vector<1x128x9xbf16> to vector<128x9xbf16>
    %37 = arith.extf %36 : vector<128x9xbf16> to vector<128x9xf32>
    %38 = arith.mulf %37, %25 : vector<128x9xf32>
    %39 = arith.addf %34, %38 : vector<128x9xf32>
    %c0_33 = arith.constant 0 : index
    %c0_34 = arith.constant 0 : index
    %40 = vector.load %arg1[%c0_33, %c0_34] : memref<128x16xbf16, #tpu.memory_space<vmem>>, vector<128x16xbf16>
    %c0_35 = arith.constant 0 : index
    %c0_36 = arith.constant 0 : index
    %41 = vector.load %arg6[%c0_35, %c0_36] : memref<16x40xbf16, #tpu.memory_space<vmem>>, vector<16x40xbf16>
    %cst_37 = arith.constant dense<0.000000e+00> : vector<128x40xf32>
    %42 = tpu.matmul %40, %41, %cst_37 {dimension_numbers = #tpu.dot_dimension_numbers<[1], [0], [0], [1], [0, 0, 1, 1], [], []>} : vector<128x16xbf16>, vector<16x40xbf16>, vector<128x40xf32> -> vector<128x40xf32>
    %43 = arith.truncf %19 : vector<128x8xf32> to vector<128x8xbf16>
    %c0_38 = arith.constant 0 : index
    %c0_39 = arith.constant 0 : index
    %44 = vector.load %arg7[%c0_38, %c0_39] : memref<8x40xbf16, #tpu.memory_space<vmem>>, vector<8x40xbf16>
    %cst_40 = arith.constant dense<0.000000e+00> : vector<128x40xf32>
    %45 = tpu.matmul %43, %44, %cst_40 {dimension_numbers = #tpu.dot_dimension_numbers<[1], [0], [0], [1], [0, 0, 1, 1], [], []>} : vector<128x8xbf16>, vector<8x40xbf16>, vector<128x40xf32> -> vector<128x40xf32>
    %46 = arith.addf %42, %45 : vector<128x40xf32>
    %c0_41 = arith.constant 0 : index
    %c0_42 = arith.constant 0 : index
    %47 = vector.load %arg8[%c0_41, %c0_42] : memref<9x40xf32, #tpu.memory_space<vmem>>, vector<9x40xf32>
    %cst_43 = arith.constant dense<0.000000e+00> : vector<128x40xf32>
    %48 = tpu.matmul %39, %47, %cst_43 {dimension_numbers = #tpu.dot_dimension_numbers<[1], [0], [0], [1], [0, 0, 1, 1], [], []>} : vector<128x9xf32>, vector<9x40xf32>, vector<128x40xf32> -> vector<128x40xf32>
    %49 = arith.addf %46, %48 : vector<128x40xf32>
    %c0_44 = arith.constant 0 : index
    %c0_45 = arith.constant 0 : index
    %50 = vector.load %arg9[%c0_44, %c0_45] : memref<1x40xf32, #tpu.memory_space<vmem>>, vector<1x40xf32>
    %51 = vector.broadcast %50 : vector<1x40xf32> to vector<128x40xf32>
    %52 = arith.addf %49, %51 : vector<128x40xf32>
    %53 = arith.negf %52 : vector<128x40xf32>
    %54 = math.exp %53 : vector<128x40xf32>
    %cst_46 = arith.constant 1.000000e+00 : f32
    %55 = vector.broadcast %cst_46 : f32 to vector<128x40xf32>
    %56 = arith.addf %55, %54 : vector<128x40xf32>
    %57 = arith.divf %55, %56 : vector<128x40xf32>
    %58 = arith.mulf %52, %57 : vector<128x40xf32>
    %59 = arith.truncf %58 : vector<128x40xf32> to vector<128x40xbf16>
    %c0_47 = arith.constant 0 : index
    %c0_48 = arith.constant 0 : index
    %60 = vector.load %arg10[%c0_47, %c0_48] : memref<40x40xbf16, #tpu.memory_space<vmem>>, vector<40x40xbf16>
    %cst_49 = arith.constant dense<0.000000e+00> : vector<128x40xf32>
    %61 = tpu.matmul %59, %60, %cst_49 {dimension_numbers = #tpu.dot_dimension_numbers<[1], [0], [0], [1], [0, 0, 1, 1], [], []>} : vector<128x40xbf16>, vector<40x40xbf16>, vector<128x40xf32> -> vector<128x40xf32>
    %c0_50 = arith.constant 0 : index
    %c0_51 = arith.constant 0 : index
    %62 = vector.load %arg11[%c0_50, %c0_51] : memref<1x40xf32, #tpu.memory_space<vmem>>, vector<1x40xf32>
    %63 = vector.broadcast %62 : vector<1x40xf32> to vector<128x40xf32>
    %64 = arith.addf %61, %63 : vector<128x40xf32>
    %65 = arith.truncf %7 : vector<128x8xf32> to vector<128x8xbf16>
    %c0_52 = arith.constant 0 : index
    %c0_53 = arith.constant 0 : index
    %c0_54 = arith.constant 0 : index
    %66 = vector.load %arg12[%c0_52, %c0_53, %c0_54] : memref<3x8x40xbf16, #tpu.memory_space<vmem>>, vector<1x8x40xbf16>
    %67 = vector.shape_cast %66 : vector<1x8x40xbf16> to vector<8x40xbf16>
    %cst_55 = arith.constant dense<0.000000e+00> : vector<128x40xf32>
    %68 = tpu.matmul %65, %67, %cst_55 {dimension_numbers = #tpu.dot_dimension_numbers<[1], [0], [0], [1], [0, 0, 1, 1], [], []>} : vector<128x8xbf16>, vector<8x40xbf16>, vector<128x40xf32> -> vector<128x40xf32>
    %69 = arith.truncf %9 : vector<128x8xf32> to vector<128x8xbf16>
    %c1_56 = arith.constant 1 : index
    %c0_57 = arith.constant 0 : index
    %c0_58 = arith.constant 0 : index
    %70 = vector.load %arg12[%c1_56, %c0_57, %c0_58] : memref<3x8x40xbf16, #tpu.memory_space<vmem>>, vector<1x8x40xbf16>
    %71 = vector.shape_cast %70 : vector<1x8x40xbf16> to vector<8x40xbf16>
    %cst_59 = arith.constant dense<0.000000e+00> : vector<128x40xf32>
    %72 = tpu.matmul %69, %71, %cst_59 {dimension_numbers = #tpu.dot_dimension_numbers<[1], [0], [0], [1], [0, 0, 1, 1], [], []>} : vector<128x8xbf16>, vector<8x40xbf16>, vector<128x40xf32> -> vector<128x40xf32>
    %73 = arith.addf %68, %72 : vector<128x40xf32>
    %74 = arith.truncf %11 : vector<128x8xf32> to vector<128x8xbf16>
    %c2_60 = arith.constant 2 : index
    %c0_61 = arith.constant 0 : index
    %c0_62 = arith.constant 0 : index
    %75 = vector.load %arg12[%c2_60, %c0_61, %c0_62] : memref<3x8x40xbf16, #tpu.memory_space<vmem>>, vector<1x8x40xbf16>
    %76 = vector.shape_cast %75 : vector<1x8x40xbf16> to vector<8x40xbf16>
    %cst_63 = arith.constant dense<0.000000e+00> : vector<128x40xf32>
    %77 = tpu.matmul %74, %76, %cst_63 {dimension_numbers = #tpu.dot_dimension_numbers<[1], [0], [0], [1], [0, 0, 1, 1], [], []>} : vector<128x8xbf16>, vector<8x40xbf16>, vector<128x40xf32> -> vector<128x40xf32>
    %78 = arith.addf %73, %77 : vector<128x40xf32>
    %79 = arith.negf %64 : vector<128x40xf32>
    %80 = math.exp %79 : vector<128x40xf32>
    %cst_64 = arith.constant 1.000000e+00 : f32
    %81 = vector.broadcast %cst_64 : f32 to vector<128x40xf32>
    %82 = arith.addf %81, %80 : vector<128x40xf32>
    %83 = arith.divf %81, %82 : vector<128x40xf32>
    %84 = arith.mulf %78, %83 : vector<128x40xf32>
    %85 = arith.addf %58, %84 : vector<128x40xf32>
    %c0_65 = arith.constant 0 : index
    %c0_66 = arith.constant 0 : index
    %86 = vector.load %arg13[%c0_65, %c0_66] : memref<128x40xf32, #tpu.memory_space<vmem>>, vector<128x40xf32>
    tpu.vector_store %arg13[%c0_65, %c0_66], %85 {strides = array<i32>} : memref<128x40xf32, #tpu.memory_space<vmem>>, vector<128x40xf32>,
    return
  }
  func.func @transform_0(%arg0: i32) -> (i32, i32) {
    %c0_i32 = arith.constant 0 : i32
    %c0_i32_0 = arith.constant 0 : i32
    return %arg0, %c0_i32 : i32, i32
  }
  func.func @transform_1(%arg0: i32) -> (i32, i32, i32) {
    %c0_i32 = arith.constant 0 : i32
    %c0_i32_0 = arith.constant 0 : i32
    %c0_i32_1 = arith.constant 0 : i32
    return %c0_i32, %arg0, %c0_i32_0 : i32, i32, i32
  }
  func.func @transform_2(%arg0: i32) -> (i32, i32, i32) {
    %c0_i32 = arith.constant 0 : i32
    %c0_i32_0 = arith.constant 0 : i32
    %c0_i32_1 = arith.constant 0 : i32
    return %c0_i32, %arg0, %c0_i32_0 : i32, i32, i32
  }
  func.func @transform_3(%arg0: i32) -> (i32, i32) {
    %c0_i32 = arith.constant 0 : i32
    %c0_i32_0 = arith.constant 0 : i32
    %c0_i32_1 = arith.constant 0 : i32
    return %c0_i32, %c0_i32_0 : i32, i32
  }
  func.func @transform_4(%arg0: i32) -> (i32, i32) {
    %c0_i32 = arith.constant 0 : i32
    %c0_i32_0 = arith.constant 0 : i32
    %c0_i32_1 = arith.constant 0 : i32
    return %c0_i32, %c0_i32_0 : i32, i32
  }
  func.func @transform_5(%arg0: i32) -> (i32, i32) {
    %c0_i32 = arith.constant 0 : i32
    %c0_i32_0 = arith.constant 0 : i32
    %c0_i32_1 = arith.constant 0 : i32
    return %c0_i32, %c0_i32_0 : i32, i32
  }
  func.func @transform_6(%arg0: i32) -> (i32, i32) {
    %c0_i32 = arith.constant 0 : i32
    %c0_i32_0 = arith.constant 0 : i32
    %c0_i32_1 = arith.constant 0 : i32
    return %c0_i32, %c0_i32_0 : i32, i32
  }
  func.func @transform_7(%arg0: i32) -> (i32, i32) {
    %c0_i32 = arith.constant 0 : i32
    %c0_i32_0 = arith.constant 0 : i32
    %c0_i32_1 = arith.constant 0 : i32
    return %c0_i32, %c0_i32_0 : i32, i32
  }
  func.func @transform_8(%arg0: i32) -> (i32, i32) {
    %c0_i32 = arith.constant 0 : i32
    %c0_i32_0 = arith.constant 0 : i32
    %c0_i32_1 = arith.constant 0 : i32
    return %c0_i32, %c0_i32_0 : i32, i32
  }
  func.func @transform_9(%arg0: i32) -> (i32, i32) {
    %c0_i32 = arith.constant 0 : i32
    %c0_i32_0 = arith.constant 0 : i32
    %c0_i32_1 = arith.constant 0 : i32
    return %c0_i32, %c0_i32_0 : i32, i32
  }
  func.func @transform_10(%arg0: i32) -> (i32, i32) {
    %c0_i32 = arith.constant 0 : i32
    %c0_i32_0 = arith.constant 0 : i32
    %c0_i32_1 = arith.constant 0 : i32
    return %c0_i32, %c0_i32_0 : i32, i32
  }
  func.func @transform_11(%arg0: i32) -> (i32, i32, i32) {
    %c0_i32 = arith.constant 0 : i32
    %c0_i32_0 = arith.constant 0 : i32
    %c0_i32_1 = arith.constant 0 : i32
    %c0_i32_2 = arith.constant 0 : i32
    return %c0_i32, %c0_i32_0, %c0_i32_1 : i32, i32, i32
  }
  func.func @transform_12(%arg0: i32) -> (i32, i32) {
    %c0_i32 = arith.constant 0 : i32
    %c0_i32_0 = arith.constant 0 : i32
    return %arg0, %c0_i32 : i32, i32
  }
}

</mosaic_0001>

<bundles_post_ra>
// kernel: gcp_forward.1
= control target key start
LH: loop header
LB: loop body
LE: loop exit
PB: predicated region body
PF: predicated region fallthrough
CT: control target
= control target key end

     0   :  { %s7389_s0 = inlined_call_operand.vmem [shape: bf16[200,16], index: 0, kind: input, shape index: {}]   ;;  %s7390_s1 = inlined_call_operand.vmem [shape: bf16[3,200,8], index: 1, kind: input, shape index: {}]   ;;  %s7391_s2 = inlined_call_operand.vmem [shape: bf16[3,200,9], index: 2, kind: input, shape index: {}]   ;;  %s7392_s3 = inlined_call_operand.vmem [shape: bf16[8,8], index: 3, kind: input, shape index: {}]   ;;  %s7393_s4 = inlined_call_operand.vmem [shape: bf16[8,9], index: 4, kind: input, shape index: {}]   ;;  %s7394_s5 = inlined_call_operand.vmem [shape: bf16[16,40], index: 5, kind: input, shape index: {}]   ;;  %s7395_s6 = inlined_call_operand.vmem [shape: bf16[8,40], index: 6, kind: input, shape index: {}]   ;;  %s7396_s7 = inlined_call_operand.vmem [shape: f32[9,40], index: 7, kind: input, shape index: {}]   ;;  %s7397_s8 = inlined_call_operand.vmem [shape: f32[1,40], index: 8, kind: input, shape index: {}]   ;;  %s7398_s9 = inlined_call_operand.vmem [shape: bf16[40,40], index: 9, kind: input, shape index: {}]   ;;  %s7399_s10 = inlined_call_operand.vmem [shape: f32[1,40], index: 10, kind: input, shape index: {}]   ;;  %s7400_s11 = inlined_call_operand.vmem [shape: bf16[3,8,40], index: 11, kind: input, shape index: {}]   ;;  %s7401_s12 = inlined_call_operand.vmem [shape: f32[200,40], index: 12, kind: output, shape index: {}]  }
   0x1   :  { %7446 = sst [smem:[#allocation49_spill]] %s7390_s1 }
   0x2   :  { %s5734_s21 = smov 0   ;;  %s5736_s22 = smov 0  }
   0x3   :  { %s5738_s23 = smov 0  }
   0x4 LB: > { %s5750_s24 = sadd.s32 4294967295, %s5571_s23   ;;  %s5753_s25 = sadd.s32 1, %s5571_s23   ;;  %s5571_s23 = sphi %s5738_s23, %s7574_s23   ;;  %s5567_s22 = sphi %s5736_s22, %s7577_s22   ;;  %s5563_s21 = sphi %s5734_s21, %s7576_s21  }
   0x5   : > { %7447 = sst [smem:[#allocation5_spill]] %s5753_s25  ;;  %s52_s26 = ssub.s32 %s5571_s23, %s5753_s25 }
   0x6   : > { %s55_s27 = sadd.s32 1, %s5567_s22  ;;  %p53_p0 = scmp.eq.s32.totalorder %s52_s26, 0 }
   0x7   : > { %p62_p1 = scmp.ne.s32.totalorder %s5567_s22, %s5563_s21  ;;  %p63_p2 = scmp.eq.s32.totalorder %s5571_s23, 0 }
   0x8   : > { %p307_p3 = scmp.eq.s32.totalorder %s5750_s24, 1  ;;  %p4223_p6 = scmp.ge.s32.totalorder %s5571_s23, 2 }
   0x9   : > { %s5763_s28 = scalar_select %p53_p0, %s5567_s22, %s55_s27  }
   0xa   : > { %p5765_p4 = por %p63_p2, %p62_p1  ;;  %p5769_p5 = por %p307_p3, %p62_p1 }
   0xb   : > { %7448 = sst [smem:[#allocation6_spill]] %s5763_s28  ;;  %356 = sbr.rel (%p4223_p6) target bundleno = 170 (0xaa), region = 52 }
  0x10   : > { %376 = sbr.rel (!%p5765_p4) target bundleno = 93 (0x5d), region = 60  ;;  %s378_s13 = sand.u32 (%p5765_p4), 1, %s5567_s22  }
  0x11   : > { %s4224_s14 = sshll.u32 (%p5765_p4), %s5571_s23, 4  ;;  %s5038_s15 = smul.u32 (%p5765_p4), 192, %s378_s13 }
  0x12   : > { %s382_s16 = ssub.s32 (%p5765_p4), 25, %s4224_s14  ;;  %s4520_s17 = sshll.u32 (%p5765_p4), %s5571_s23, 6 }
  0x13   : > { %p383_p7 = scmp.lt.s32.totalorder (%p5765_p4), %s382_s16, 16  ;;  %s7451_s1 = sld [smem:[#allocation49_spill]] (%p5765_p4) }
  0x14   : > { %s5787_s27 = scalar_lea.vmem (%p5765_p4), [#allocation2], %s5038_s15  }
  0x15   : > { %s7579_s16 = smov (!%p383_p7, %s382_s16), 16 }
  0x16   : > { %s385_s26 = smul.u32 192, %s7579_s16 }
  0x18   : > { %p4227_p8 = scmp.eq.s32.totalorder %s385_s26, 0 }
  0x19   : > { %s5782_s20 = scalar_lea.vmem %s7451_s1, %s4520_s17   ;;  %s5790_s28 = sshrl.u32 (!%p4227_p8), %s7579_s16, 4 }
  0x1a   : > { %391 = sbr.rel (%p4227_p8) target bundleno = 93 (0x5d), region = 64  ;;  %p4228_p9 = scmp.le.s32.totalorder (!%p4227_p8), %s5790_s28, 0 }
  0x1f   : > { %4109 = sbr.rel (%p4228_p9) target bundleno = 75 (0x4b), region = 326  ;;  %s7452_s13 = smov (!%p4228_p9), %s5787_s27 }
  0x20   : > { %s7453_s14 = smov (!%p4228_p9), %s5782_s20  ;;  %s5799_s17 = smov (!%p4228_p9), 0  }
  0x21   : > { %s5801_s18 = smov (!%p4228_p9), 0  }
  0x24 LB: >> { %v408_v0 = vld [vmem:[%s5579_s14] sm:$0xf]  ;;  %v410_v1 = vld [vmem:[%s5579_s14 + $0x4] sm:$0xf]  ;;  %v412_v2 = vld [vmem:[%s5579_s14 + $0x8] sm:$0xf]  ;;  %s5587_s18 = sphi %s5801_s18, %s402_s18   ;;  %s5583_s17 = sphi %s5799_s17, %s7454_s17   ;;  %s5579_s14 = sphi %s7453_s14, %s509_s14   ;;  %s5575_s13 = sphi %s7452_s13, %s510_s13  }
  0x25   : >> { %409 = vst [vmem:[%s5575_s13] sm:$0xf] %v408_v0  ;;  %411 = vst [vmem:[%s5575_s13 + $0x4] sm:$0xf] %v410_v1  ;;  %v414_v3 = vld [vmem:[%s5579_s14 + $0xc] sm:$0xf]  ;;  %s504_s15 = sadd.s32 1, %s5583_s17 }
  0x26   : >> { %413 = vst [vmem:[%s5575_s13 + $0x8] sm:$0xf] %v412_v2  ;;  %v416_v4 = vld [vmem:[%s5579_s14 + $0x10] sm:$0xf]  ;;  %v418_v5 = vld [vmem:[%s5579_s14 + $0x14] sm:$0xf]  ;;  %p505_p10 = scmp.ge.s32.totalorder %s504_s15, %s5790_s28 }
  0x27   : >> { %415 = vst [vmem:[%s5575_s13 + $0xc] sm:$0xf] %v414_v3  ;;  %417 = vst [vmem:[%s5575_s13 + $0x10] sm:$0xf] %v416_v4  ;;  %v420_v6 = vld [vmem:[%s5579_s14 + $0x18] sm:$0xf] }
  0x28   : >> { %419 = vst [vmem:[%s5575_s13 + $0x14] sm:$0xf] %v418_v5  ;;  %v422_v7 = vld [vmem:[%s5579_s14 + $0x1c] sm:$0xf]  ;;  %v424_v8 = vld [vmem:[%s5579_s14 + $0x20] sm:$0xf] }
  0x29   : >> { %421 = vst [vmem:[%s5575_s13 + $0x18] sm:$0xf] %v420_v6  ;;  %423 = vst [vmem:[%s5575_s13 + $0x1c] sm:$0xf] %v422_v7  ;;  %v426_v9 = vld [vmem:[%s5579_s14 + $0x24] sm:$0xf] }
  0x2a   : >> { %425 = vst [vmem:[%s5575_s13 + $0x20] sm:$0xf] %v424_v8  ;;  %v428_v10 = vld [vmem:[%s5579_s14 + $0x28] sm:$0xf]  ;;  %v430_v11 = vld [vmem:[%s5579_s14 + $0x2c] sm:$0xf] }
  0x2b   : >> { %427 = vst [vmem:[%s5575_s13 + $0x24] sm:$0xf] %v426_v9  ;;  %429 = vst [vmem:[%s5575_s13 + $0x28] sm:$0xf] %v428_v10  ;;  %v432_v12 = vld [vmem:[%s5579_s14 + $0x30] sm:$0xf] }
  0x2c   : >> { %431 = vst [vmem:[%s5575_s13 + $0x2c] sm:$0xf] %v430_v11  ;;  %v434_v13 = vld [vmem:[%s5579_s14 + $0x34] sm:$0xf]  ;;  %v436_v14 = vld [vmem:[%s5579_s14 + $0x38] sm:$0xf] }
  0x2d   : >> { %433 = vst [vmem:[%s5575_s13 + $0x30] sm:$0xf] %v432_v12  ;;  %435 = vst [vmem:[%s5575_s13 + $0x34] sm:$0xf] %v434_v13  ;;  %v438_v15 = vld [vmem:[%s5579_s14 + $0x3c] sm:$0xf] }
  0x2e   : >> { %437 = vst [vmem:[%s5575_s13 + $0x38] sm:$0xf] %v436_v14  ;;  %v440_v16 = vld [vmem:[%s5579_s14 + $0x64] sm:$0xf]  ;;  %v442_v17 = vld [vmem:[%s5579_s14 + $0x68] sm:$0xf] }
  0x2f   : >> { %439 = vst [vmem:[%s5575_s13 + $0x3c] sm:$0xf] %v438_v15  ;;  %441 = vst [vmem:[%s5575_s13 + $0x40] sm:$0xf] %v440_v16  ;;  %v444_v18 = vld [vmem:[%s5579_s14 + $0x6c] sm:$0xf] }
  0x30   : >> { %443 = vst [vmem:[%s5575_s13 + $0x44] sm:$0xf] %v442_v17  ;;  %v446_v19 = vld [vmem:[%s5579_s14 + $0x70] sm:$0xf]  ;;  %v448_v20 = vld [vmem:[%s5579_s14 + $0x74] sm:$0xf] }
  0x31   : >> { %445 = vst [vmem:[%s5575_s13 + $0x48] sm:$0xf] %v444_v18  ;;  %447 = vst [vmem:[%s5575_s13 + $0x4c] sm:$0xf] %v446_v19  ;;  %v450_v21 = vld [vmem:[%s5579_s14 + $0x78] sm:$0xf] }
  0x32   : >> { %449 = vst [vmem:[%s5575_s13 + $0x50] sm:$0xf] %v448_v20  ;;  %v452_v22 = vld [vmem:[%s5579_s14 + $0x7c] sm:$0xf]  ;;  %v454_v23 = vld [vmem:[%s5579_s14 + $0x80] sm:$0xf] }
  0x33   : >> { %451 = vst [vmem:[%s5575_s13 + $0x54] sm:$0xf] %v450_v21  ;;  %453 = vst [vmem:[%s5575_s13 + $0x58] sm:$0xf] %v452_v22  ;;  %v456_v24 = vld [vmem:[%s5579_s14 + $0x84] sm:$0xf] }
  0x34   : >> { %455 = vst [vmem:[%s5575_s13 + $0x5c] sm:$0xf] %v454_v23  ;;  %v458_v25 = vld [vmem:[%s5579_s14 + $0x88] sm:$0xf]  ;;  %v460_v26 = vld [vmem:[%s5579_s14 + $0x8c] sm:$0xf] }
  0x35   : >> { %457 = vst [vmem:[%s5575_s13 + $0x60] sm:$0xf] %v456_v24  ;;  %459 = vst [vmem:[%s5575_s13 + $0x64] sm:$0xf] %v458_v25  ;;  %v462_v27 = vld [vmem:[%s5579_s14 + $0x90] sm:$0xf] }
  0x36   : >> { %461 = vst [vmem:[%s5575_s13 + $0x68] sm:$0xf] %v460_v26  ;;  %v464_v28 = vld [vmem:[%s5579_s14 + $0x94] sm:$0xf]  ;;  %v466_v29 = vld [vmem:[%s5579_s14 + $0x98] sm:$0xf] }
  0x37   : >> { %463 = vst [vmem:[%s5575_s13 + $0x6c] sm:$0xf] %v462_v27  ;;  %465 = vst [vmem:[%s5575_s13 + $0x70] sm:$0xf] %v464_v28  ;;  %v468_v30 = vld [vmem:[%s5579_s14 + $0x9c] sm:$0xf] }
  0x38   : >> { %467 = vst [vmem:[%s5575_s13 + $0x74] sm:$0xf] %v466_v29  ;;  %v470_v31 = vld [vmem:[%s5579_s14 + $0xa0] sm:$0xf]  ;;  %v472_v32 = vld [vmem:[%s5579_s14 + $0xc8] sm:$0xf] }
  0x39   : >> { %469 = vst [vmem:[%s5575_s13 + $0x78] sm:$0xf] %v468_v30  ;;  %471 = vst [vmem:[%s5575_s13 + $0x7c] sm:$0xf] %v470_v31  ;;  %v474_v33 = vld [vmem:[%s5579_s14 + $0xcc] sm:$0xf] }
  0x3a   : >> { %473 = vst [vmem:[%s5575_s13 + $0x80] sm:$0xf] %v472_v32  ;;  %v476_v34 = vld [vmem:[%s5579_s14 + $0xd0] sm:$0xf]  ;;  %v478_v35 = vld [vmem:[%s5579_s14 + $0xd4] sm:$0xf] }
  0x3b   : >> { %475 = vst [vmem:[%s5575_s13 + $0x84] sm:$0xf] %v474_v33  ;;  %477 = vst [vmem:[%s5575_s13 + $0x88] sm:$0xf] %v476_v34  ;;  %v480_v36 = vld [vmem:[%s5579_s14 + $0xd8] sm:$0xf] }
  0x3c   : >> { %479 = vst [vmem:[%s5575_s13 + $0x8c] sm:$0xf] %v478_v35  ;;  %v482_v37 = vld [vmem:[%s5579_s14 + $0xdc] sm:$0xf]  ;;  %v484_v38 = vld [vmem:[%s5579_s14 + $0xe0] sm:$0xf] }
  0x3d   : >> { %481 = vst [vmem:[%s5575_s13 + $0x90] sm:$0xf] %v480_v36  ;;  %483 = vst [vmem:[%s5575_s13 + $0x94] sm:$0xf] %v482_v37  ;;  %v486_v39 = vld [vmem:[%s5579_s14 + $0xe4] sm:$0xf] }
  0x3e   : >> { %485 = vst [vmem:[%s5575_s13 + $0x98] sm:$0xf] %v484_v38  ;;  %v488_v40 = vld [vmem:[%s5579_s14 + $0xe8] sm:$0xf]  ;;  %v490_v41 = vld [vmem:[%s5579_s14 + $0xec] sm:$0xf] }
  0x3f   : >> { %487 = vst [vmem:[%s5575_s13 + $0x9c] sm:$0xf] %v486_v39  ;;  %489 = vst [vmem:[%s5575_s13 + $0xa0] sm:$0xf] %v488_v40  ;;  %v492_v42 = vld [vmem:[%s5579_s14 + $0xf0] sm:$0xf] }
  0x40   : >> { %491 = vst [vmem:[%s5575_s13 + $0xa4] sm:$0xf] %v490_v41  ;;  %v494_v43 = vld [vmem:[%s5579_s14 + $0xf4] sm:$0xf]  ;;  %v496_v44 = vld [vmem:[%s5579_s14 + $0xf8] sm:$0xf] }
  0x41   : >> { %493 = vst [vmem:[%s5575_s13 + $0xa8] sm:$0xf] %v492_v42  ;;  %495 = vst [vmem:[%s5575_s13 + $0xac] sm:$0xf] %v494_v43  ;;  %v498_v45 = vld [vmem:[%s5579_s14 + $0xfc] sm:$0xf] }
  0x42   : >> { %497 = vst [vmem:[%s5575_s13 + $0xb0] sm:$0xf] %v496_v44  ;;  %v500_v46 = vld [vmem:[%s5579_s14 + $0x100] sm:$0xf]  ;;  %v502_v47 = vld [vmem:[%s5579_s14 + $0x104] sm:$0xf] }
  0x43   : >> { %499 = vst [vmem:[%s5575_s13 + $0xb4] sm:$0xf] %v498_v45  ;;  %501 = vst [vmem:[%s5575_s13 + $0xb8] sm:$0xf] %v500_v46  ;;  %s7581_s15 = smov (%p505_p10, %s504_s15), 0  ;;  %s402_s18 = sadd.s32 1, %s5587_s18  }
  0x44   : >> { %503 = vst [vmem:[%s5575_s13 + $0xbc] sm:$0xf] %v502_v47  ;;  %s4229_s19 = sshll.u32 %s7581_s15, 6  ;;  %p401_p11 = scmp.ge.s32.totalorder %s402_s18, %s5790_s28 }
  0x45   : >> { %s509_s14 = scalar_lea.vmem %s5782_s20, %s4229_s19   ;;  %s510_s13 = scalar_lea.vmem %s5787_s27, %s4229_s19 [#allocation2]  }
  0x46   : >> { %s7454_s17 = smov %s7581_s15  ;;  %404 = sbr.rel (!%p401_p11) target bundleno = 36 (0x24), region = 332 }
  0x4b PF: > { %s5926_s26 = sand.u32 15, %s7579_s16   ;;  %s4521_s19 = sshll.u32 %s5790_s28, 6 }
  0x4c   : > { %s5930_s1 = scalar_lea.vmem %s5782_s20, %s4521_s19   ;;  %s5933_s25 = scalar_lea.vmem %s5787_s27, %s4521_s19 [#allocation2]  }
  0x4d   : > { %p4234_p12 = scmp.le.s32.totalorder %s5926_s26, 0 }
  0x4e   : > { %s7455_s18 = smov (!%p4234_p12), %s5933_s25  ;;  %s5593_s15 = smov (!%p4234_p12), %s5930_s1  }
  0x4f   : > { %4123 = sbr.rel (%p4234_p12) target bundleno = 93 (0x5d), region = 337  ;;  %s5597_s13 = smov (!%p4234_p12), 0  }
  0x50   : > { %s5601_s14 = smov (!%p4234_p12), 0  }
  0x54 LB: >> { %v527_v48 = vld [vmem:[%s5595_s15] sm:$0xf]  ;;  %v529_v49 = vld [vmem:[%s5595_s15 + $0x64] sm:$0xf]  ;;  %v531_v50 = vld [vmem:[%s5595_s15 + $0xc8] sm:$0xf]  ;;  %s5603_s14 = sphi %s5601_s14, %s521_s14   ;;  %s5599_s13 = sphi %s5597_s13, %s5598_s13   ;;  %s5595_s15 = sphi %s5593_s15, %s538_s15   ;;  %s5591_s18 = sphi %s7455_s18, %s539_s18  }
  0x55   : >> { %528 = vst [vmem:[%s5591_s18] sm:$0xf] %v527_v48  ;;  %530 = vst [vmem:[%s5591_s18 + $0x40] sm:$0xf] %v529_v49  ;;  %s533_s28 = sadd.s32 1, %s5599_s13  ;;  %s521_s14 = sadd.s32 1, %s5603_s14  }
  0x56   : >> { %532 = vst [vmem:[%s5591_s18 + $0x80] sm:$0xf] %v531_v50  ;;  %p534_p13 = scmp.ge.s32.totalorder %s533_s28, %s5926_s26  ;;  %p520_p0 = scmp.ge.s32.totalorder %s521_s14, %s5926_s26 }
  0x58   : >> { %s7583_s28 = smov (%p534_p13, %s533_s28), 0  ;;  %523 = sbr.rel (!%p520_p0) target bundleno = 84 (0x54), region = 343 }
  0x59   : >> { %s4235_s16 = sshll.u32 %s7583_s28, 2  ;;  %s5598_s13 = smov %s7583_s28  }
  0x5a   : >> { %s538_s15 = scalar_lea.vmem %s5930_s1, %s4235_s16   ;;  %s539_s18 = scalar_lea.vmem %s5933_s25, %s4235_s16 [#allocation2]  }
  0x5d PF: > { %729 = sbr.rel (!%p5765_p4) target bundleno = 170 (0xaa), region = 122  ;;  %s731_s20 = sand.u32 (%p5765_p4), 1, %s5567_s22  }
  0x5e   : > { %s4237_s27 = sshll.u32 (%p5765_p4), %s5571_s23, 4  ;;  %s5039_s17 = smul.u32 (%p5765_p4), 192, %s731_s20 }
  0x5f   : > { %s735_s19 = ssub.s32 (%p5765_p4), 25, %s4237_s27  ;;  %s4523_s13 = sshll.u32 (%p5765_p4), %s5571_s23, 6 }
  0x60   : > { %p736_p1 = scmp.lt.s32.totalorder (%p5765_p4), %s735_s19, 16  ;;  %s5955_s14 = scalar_lea.vmem (%p5765_p4), %s7391_s2, %s4523_s13  }
  0x61   : > { %s5960_s25 = scalar_lea.vmem (%p5765_p4), [#allocation3], %s5039_s17  }
  0x62   : > { %s7585_s19 = smov (!%p736_p1, %s735_s19), 16 }
  0x63   : > { %s738_s1 = smul.u32 192, %s7585_s19 }
  0x65   : > { %p4240_p2 = scmp.eq.s32.totalorder %s738_s1, 0 }
  0x66   : > { %s5963_s29 = sshrl.u32 (!%p4240_p2), %s7585_s19, 4 }
  0x67   : > { %744 = sbr.rel (%p4240_p2) target bundleno = 170 (0xaa), region = 126  ;;  %p4241_p3 = scmp.le.s32.totalorder (!%p4240_p2), %s5963_s29, 0 }
  0x6c   : > { %4137 = sbr.rel (%p4241_p3) target bundleno = 152 (0x98), region = 348  ;;  %s7456_s26 = smov (!%p4241_p3), %s5960_s25 }
  0x6d   : > { %s7457_s28 = smov (!%p4241_p3), %s5955_s14  ;;  %s5972_s16 = smov (!%p4241_p3), 0  }
  0x6e   : > { %s5974_s20 = smov (!%p4241_p3), 0  }
  0x71 LB: >> { %v761_v51 = vld [vmem:[%s5611_s28] sm:$0xf]  ;;  %v763_v52 = vld [vmem:[%s5611_s28 + $0x4] sm:$0xf]  ;;  %v765_v53 = vld [vmem:[%s5611_s28 + $0x8] sm:$0xf]  ;;  %s5619_s20 = sphi %s5974_s20, %s755_s20   ;;  %s5615_s16 = sphi %s5972_s16, %s7458_s16   ;;  %s5611_s28 = sphi %s7457_s28, %s862_s28   ;;  %s5607_s26 = sphi %s7456_s26, %s863_s26  }
  0x72   : >> { %762 = vst [vmem:[%s5607_s26] sm:$0xf] %v761_v51  ;;  %764 = vst [vmem:[%s5607_s26 + $0x4] sm:$0xf] %v763_v52  ;;  %v767_v54 = vld [vmem:[%s5611_s28 + $0xc] sm:$0xf]  ;;  %s857_s27 = sadd.s32 1, %s5615_s16 }
  0x73   : >> { %766 = vst [vmem:[%s5607_s26 + $0x8] sm:$0xf] %v765_v53  ;;  %v769_v55 = vld [vmem:[%s5611_s28 + $0x10] sm:$0xf]  ;;  %v771_v56 = vld [vmem:[%s5611_s28 + $0x14] sm:$0xf]  ;;  %p858_p4 = scmp.ge.s32.totalorder %s857_s27, %s5963_s29 }
  0x74   : >> { %768 = vst [vmem:[%s5607_s26 + $0xc] sm:$0xf] %v767_v54  ;;  %770 = vst [vmem:[%s5607_s26 + $0x10] sm:$0xf] %v769_v55  ;;  %v773_v57 = vld [vmem:[%s5611_s28 + $0x18] sm:$0xf] }
  0x75   : >> { %772 = vst [vmem:[%s5607_s26 + $0x14] sm:$0xf] %v771_v56  ;;  %v775_v58 = vld [vmem:[%s5611_s28 + $0x1c] sm:$0xf]  ;;  %v777_v59 = vld [vmem:[%s5611_s28 + $0x20] sm:$0xf] }
  0x76   : >> { %774 = vst [vmem:[%s5607_s26 + $0x18] sm:$0xf] %v773_v57  ;;  %776 = vst [vmem:[%s5607_s26 + $0x1c] sm:$0xf] %v775_v58  ;;  %v779_v60 = vld [vmem:[%s5611_s28 + $0x24] sm:$0xf] }
  0x77   : >> { %778 = vst [vmem:[%s5607_s26 + $0x20] sm:$0xf] %v777_v59  ;;  %v781_v61 = vld [vmem:[%s5611_s28 + $0x28] sm:$0xf]  ;;  %v783_v62 = vld [vmem:[%s5611_s28 + $0x2c] sm:$0xf] }
  0x78   : >> { %780 = vst [vmem:[%s5607_s26 + $0x24] sm:$0xf] %v779_v60  ;;  %782 = vst [vmem:[%s5607_s26 + $0x28] sm:$0xf] %v781_v61  ;;  %v785_v63 = vld [vmem:[%s5611_s28 + $0x30] sm:$0xf] }
  0x79   : >> { %784 = vst [vmem:[%s5607_s26 + $0x2c] sm:$0xf] %v783_v62  ;;  %v787_v0 = vld [vmem:[%s5611_s28 + $0x34] sm:$0xf]  ;;  %v789_v1 = vld [vmem:[%s5611_s28 + $0x38] sm:$0xf] }
  0x7a   : >> { %786 = vst [vmem:[%s5607_s26 + $0x30] sm:$0xf] %v785_v63  ;;  %788 = vst [vmem:[%s5607_s26 + $0x34] sm:$0xf] %v787_v0  ;;  %v791_v2 = vld [vmem:[%s5611_s28 + $0x3c] sm:$0xf] }
  0x7b   : >> { %790 = vst [vmem:[%s5607_s26 + $0x38] sm:$0xf] %v789_v1  ;;  %v793_v3 = vld [vmem:[%s5611_s28 + $0x64] sm:$0xf]  ;;  %v795_v4 = vld [vmem:[%s5611_s28 + $0x68] sm:$0xf] }
  0x7c   : >> { %792 = vst [vmem:[%s5607_s26 + $0x3c] sm:$0xf] %v791_v2  ;;  %794 = vst [vmem:[%s5607_s26 + $0x40] sm:$0xf] %v793_v3  ;;  %v797_v5 = vld [vmem:[%s5611_s28 + $0x6c] sm:$0xf] }
  0x7d   : >> { %796 = vst [vmem:[%s5607_s26 + $0x44] sm:$0xf] %v795_v4  ;;  %v799_v6 = vld [vmem:[%s5611_s28 + $0x70] sm:$0xf]  ;;  %v801_v7 = vld [vmem:[%s5611_s28 + $0x74] sm:$0xf] }
  0x7e   : >> { %798 = vst [vmem:[%s5607_s26 + $0x48] sm:$0xf] %v797_v5  ;;  %800 = vst [vmem:[%s5607_s26 + $0x4c] sm:$0xf] %v799_v6  ;;  %v803_v8 = vld [vmem:[%s5611_s28 + $0x78] sm:$0xf] }
  0x7f   : >> { %802 = vst [vmem:[%s5607_s26 + $0x50] sm:$0xf] %v801_v7  ;;  %v805_v9 = vld [vmem:[%s5611_s28 + $0x7c] sm:$0xf]  ;;  %v807_v10 = vld [vmem:[%s5611_s28 + $0x80] sm:$0xf] }
  0x80   : >> { %804 = vst [vmem:[%s5607_s26 + $0x54] sm:$0xf] %v803_v8  ;;  %806 = vst [vmem:[%s5607_s26 + $0x58] sm:$0xf] %v805_v9  ;;  %v809_v11 = vld [vmem:[%s5611_s28 + $0x84] sm:$0xf] }
  0x81   : >> { %808 = vst [vmem:[%s5607_s26 + $0x5c] sm:$0xf] %v807_v10  ;;  %v811_v12 = vld [vmem:[%s5611_s28 + $0x88] sm:$0xf]  ;;  %v813_v13 = vld [vmem:[%s5611_s28 + $0x8c] sm:$0xf] }
  0x82   : >> { %810 = vst [vmem:[%s5607_s26 + $0x60] sm:$0xf] %v809_v11  ;;  %812 = vst [vmem:[%s5607_s26 + $0x64] sm:$0xf] %v811_v12  ;;  %v815_v14 = vld [vmem:[%s5611_s28 + $0x90] sm:$0xf] }
  0x83   : >> { %814 = vst [vmem:[%s5607_s26 + $0x68] sm:$0xf] %v813_v13  ;;  %v817_v15 = vld [vmem:[%s5611_s28 + $0x94] sm:$0xf]  ;;  %v819_v16 = vld [vmem:[%s5611_s28 + $0x98] sm:$0xf] }
  0x84   : >> { %816 = vst [vmem:[%s5607_s26 + $0x6c] sm:$0xf] %v815_v14  ;;  %818 = vst [vmem:[%s5607_s26 + $0x70] sm:$0xf] %v817_v15  ;;  %v821_v17 = vld [vmem:[%s5611_s28 + $0x9c] sm:$0xf] }
  0x85   : >> { %820 = vst [vmem:[%s5607_s26 + $0x74] sm:$0xf] %v819_v16  ;;  %v823_v18 = vld [vmem:[%s5611_s28 + $0xa0] sm:$0xf]  ;;  %v825_v19 = vld [vmem:[%s5611_s28 + $0xc8] sm:$0xf] }
  0x86   : >> { %822 = vst [vmem:[%s5607_s26 + $0x78] sm:$0xf] %v821_v17  ;;  %824 = vst [vmem:[%s5607_s26 + $0x7c] sm:$0xf] %v823_v18  ;;  %v827_v20 = vld [vmem:[%s5611_s28 + $0xcc] sm:$0xf] }
  0x87   : >> { %826 = vst [vmem:[%s5607_s26 + $0x80] sm:$0xf] %v825_v19  ;;  %v829_v21 = vld [vmem:[%s5611_s28 + $0xd0] sm:$0xf]  ;;  %v831_v22 = vld [vmem:[%s5611_s28 + $0xd4] sm:$0xf] }
  0x88   : >> { %828 = vst [vmem:[%s5607_s26 + $0x84] sm:$0xf] %v827_v20  ;;  %830 = vst [vmem:[%s5607_s26 + $0x88] sm:$0xf] %v829_v21  ;;  %v833_v23 = vld [vmem:[%s5611_s28 + $0xd8] sm:$0xf] }
  0x89   : >> { %832 = vst [vmem:[%s5607_s26 + $0x8c] sm:$0xf] %v831_v22  ;;  %v835_v24 = vld [vmem:[%s5611_s28 + $0xdc] sm:$0xf]  ;;  %v837_v25 = vld [vmem:[%s5611_s28 + $0xe0] sm:$0xf] }
  0x8a   : >> { %834 = vst [vmem:[%s5607_s26 + $0x90] sm:$0xf] %v833_v23  ;;  %836 = vst [vmem:[%s5607_s26 + $0x94] sm:$0xf] %v835_v24  ;;  %v839_v26 = vld [vmem:[%s5611_s28 + $0xe4] sm:$0xf] }
  0x8b   : >> { %838 = vst [vmem:[%s5607_s26 + $0x98] sm:$0xf] %v837_v25  ;;  %v841_v27 = vld [vmem:[%s5611_s28 + $0xe8] sm:$0xf]  ;;  %v843_v28 = vld [vmem:[%s5611_s28 + $0xec] sm:$0xf] }
  0x8c   : >> { %840 = vst [vmem:[%s5607_s26 + $0x9c] sm:$0xf] %v839_v26  ;;  %842 = vst [vmem:[%s5607_s26 + $0xa0] sm:$0xf] %v841_v27  ;;  %v845_v29 = vld [vmem:[%s5611_s28 + $0xf0] sm:$0xf] }
  0x8d   : >> { %844 = vst [vmem:[%s5607_s26 + $0xa4] sm:$0xf] %v843_v28  ;;  %v847_v30 = vld [vmem:[%s5611_s28 + $0xf4] sm:$0xf]  ;;  %v849_v31 = vld [vmem:[%s5611_s28 + $0xf8] sm:$0xf] }
  0x8e   : >> { %846 = vst [vmem:[%s5607_s26 + $0xa8] sm:$0xf] %v845_v29  ;;  %848 = vst [vmem:[%s5607_s26 + $0xac] sm:$0xf] %v847_v30  ;;  %v851_v32 = vld [vmem:[%s5611_s28 + $0xfc] sm:$0xf] }
  0x8f   : >> { %850 = vst [vmem:[%s5607_s26 + $0xb0] sm:$0xf] %v849_v31  ;;  %v853_v33 = vld [vmem:[%s5611_s28 + $0x100] sm:$0xf]  ;;  %v855_v34 = vld [vmem:[%s5611_s28 + $0x104] sm:$0xf] }
  0x90   : >> { %852 = vst [vmem:[%s5607_s26 + $0xb4] sm:$0xf] %v851_v32  ;;  %854 = vst [vmem:[%s5607_s26 + $0xb8] sm:$0xf] %v853_v33  ;;  %s7587_s27 = smov (%p858_p4, %s857_s27), 0  ;;  %s755_s20 = sadd.s32 1, %s5619_s20  }
  0x91   : >> { %856 = vst [vmem:[%s5607_s26 + $0xbc] sm:$0xf] %v855_v34  ;;  %s4242_s17 = sshll.u32 %s7587_s27, 6  ;;  %p754_p6 = scmp.ge.s32.totalorder %s755_s20, %s5963_s29 }
  0x92   : >> { %s862_s28 = scalar_lea.vmem %s5955_s14, %s4242_s17   ;;  %s863_s26 = scalar_lea.vmem %s5960_s25, %s4242_s17 [#allocation3]  }
  0x93   : >> { %s7458_s16 = smov %s7587_s27  ;;  %757 = sbr.rel (!%p754_p6) target bundleno = 113 (0x71), region = 354 }
  0x98 PF: > { %s6099_s13 = sand.u32 15, %s7585_s19   ;;  %s4524_s18 = sshll.u32 %s5963_s29, 6 }
  0x99   : > { %s6103_s15 = scalar_lea.vmem %s5955_s14, %s4524_s18   ;;  %s6106_s1 = scalar_lea.vmem %s5960_s25, %s4524_s18 [#allocation3]  }
  0x9a   : > { %p4247_p7 = scmp.le.s32.totalorder %s6099_s13, 0 }
  0x9b   : > { %s7459_s20 = smov (!%p4247_p7), %s6106_s1  ;;  %s5625_s27 = smov (!%p4247_p7), %s6103_s15  }
  0x9c   : > { %4151 = sbr.rel (%p4247_p7) target bundleno = 170 (0xaa), region = 359  ;;  %s5629_s26 = smov (!%p4247_p7), 0  }
  0x9d   : > { %s5633_s28 = smov (!%p4247_p7), 0  }
  0xa1 LB: >> { %v880_v35 = vld [vmem:[%s5627_s27] sm:$0xf]  ;;  %v882_v36 = vld [vmem:[%s5627_s27 + $0x64] sm:$0xf]  ;;  %v884_v37 = vld [vmem:[%s5627_s27 + $0xc8] sm:$0xf]  ;;  %s5635_s28 = sphi %s5633_s28, %s874_s28   ;;  %s5631_s26 = sphi %s5629_s26, %s5630_s26   ;;  %s5627_s27 = sphi %s5625_s27, %s891_s27   ;;  %s5623_s20 = sphi %s7459_s20, %s892_s20  }
  0xa2   : >> { %881 = vst [vmem:[%s5623_s20] sm:$0xf] %v880_v35  ;;  %883 = vst [vmem:[%s5623_s20 + $0x40] sm:$0xf] %v882_v36  ;;  %s886_s19 = sadd.s32 1, %s5631_s26  ;;  %s874_s28 = sadd.s32 1, %s5635_s28  }
  0xa3   : >> { %885 = vst [vmem:[%s5623_s20 + $0x80] sm:$0xf] %v884_v37  ;;  %p887_p8 = scmp.ge.s32.totalorder %s886_s19, %s6099_s13  ;;  %p873_p9 = scmp.ge.s32.totalorder %s874_s28, %s6099_s13 }
  0xa5   : >> { %s7589_s19 = smov (%p887_p8, %s886_s19), 0  ;;  %876 = sbr.rel (!%p873_p9) target bundleno = 161 (0xa1), region = 365 }
  0xa6   : >> { %s4248_s14 = sshll.u32 %s7589_s19, 2  ;;  %s5630_s26 = smov %s7589_s19  }
  0xa7   : >> { %s891_s27 = scalar_lea.vmem %s6103_s15, %s4248_s14   ;;  %s892_s20 = scalar_lea.vmem %s6106_s1, %s4248_s14 [#allocation3]  }
  0xaa PF: > { %p4250_p10 = scmp.ge.s32.totalorder %s5571_s23, 1  ;;  %p1081_p11 = scmp.lt.s32.totalorder %s5571_s23, 3 }
  0xac   : > { %p1082_p12 = pnand %p4250_p10, %p1081_p11 }
  0xae   : > { %1085 = sbr.rel (%p1082_p12) target bundleno = 1014 (0x3f6), region = 184 }
  0xb3   : > { %v1228_v38 = vld [vmem:[%s7392_s3] sm:$0xf]  ;;  %vm1294_vm0 = vcmask 1043456   ;;  %s1088_s16 = sand.u32 1, %s5563_s21   ;;  %vm1269_vm1 = vcmask 64512   ;;  %s6234_s26 = sshll.u32 %s5750_s24, 4 }
  0xb4   : > { %5027 = vmatprep.subr.msk.bf16.mxu1 %vm1294_vm0, %v1228_v38  ;;  %5026 = vmatprep.subr.msk.bf16.mxu0 %vm1294_vm0, %v1228_v38  ;;  %v1296_v39 = vsel %vm1294_vm0, %v1228_v38, 0  ;;  %s6131_s17 = smul.u32 192, %s1088_s16  ;;  %v1925_v43 = vld [vmem:[%s7393_s4] sm:$0xf]  ;;  %p1153_p13 = scmp.lt.s32.totalorder %s6234_s26, 24  ;;  %vm2768_vm2 = vcmask 1040384  }
  0xb5   : > { %5025 = vmatpush3.bf16.msra.mxu1 %v1296_v39  ;;  %4777 = vmatpush3.bf16.msra.mxu0 %v1296_v39  ;;  %v1927_v55 = vsel %vm1294_vm0, %v1925_v43, 0  ;;  %v2424_v2 = vld [vmem:[%s7395_s6] sm:$0xf]  ;;  %v6241_v5 = vld [vmem:[%s7396_s7 + $0x8] sm:$0x1]  ;;  %vm2595_vm3 = vcmask 130048  }
  0xb6   : > { %5028 = vmatprep.subr.msk.bf16.mxu1 %vm1294_vm0, %v1228_v38  ;;  %5029 = vmatprep.subr.msk.bf16.mxu0 %vm1294_vm0, %v1228_v38  ;;  %s6136_s23 = scalar_lea.vmem [#allocation2], %s6131_s17  ;;  %v2450_v3 = vsel %vm1294_vm0, %v2424_v2, 0  ;;  %v5281_v4 = vld [vmem:[%s7394_s5] sm:$0xff]   ;;  %s6663_s27 = scalar_lea.vmem [#allocation3], %s6131_s17 }
  0xb7   : > { %v5257_v40 = vld [vmem:[%s6136_s23] sm:$0xff]   ;;  %v5259_v42 = vld [vmem:[%s6136_s23 + $0x8] sm:$0xff]   ;;  %v5261_v45 = vld [vmem:[%s6136_s23 + $0x10] sm:$0xff]   ;;  %s1154_s28 = scalar_select %p1153_p13, %s6234_s26, 24 }
  0xb8   : > { %v6140_v41 = vld [vmem:[%s6136_s23 + $0x20] sm:$0xff]   ;;  %4778 = vmatprep.mubr.msk.bf16.mxu0 %vm1269_vm1, %v5257_v40  ;;  %v6150_v44 = vld [vmem:[%s6136_s23 + $0x28] sm:$0xff]   ;;  %v5262_v46 = vld [vmem:[%s6136_s23 + $0x30] sm:$0xff]   ;;  %s4526_s19 = sshll.u32 (%p5769_p5), %s5750_s24, 7 }
  0xb9   : > { %4786 = vmatprep.mubr.msk.bf16.mxu1 %vm1269_vm1, %v6140_v41  ;;  %4779 = vmatmul.mubr.msk.bf16.vlgmr.msra.gmra.mxu0 %vm1269_vm1, %v5259_v42  ;;  %v5263_v47 = vld [vmem:[%s6136_s23 + $0x18] sm:$0xff]   ;;  %v5266_v49 = vld [vmem:[%s6136_s23 + $0x80] sm:$0xff]   ;;  %v5267_v51 = vld [vmem:[%s6136_s23 + $0x48] sm:$0xff]   ;;  %s4253_s25 = sshll.u32 %s1154_s28, 2  ;;  %s4251_s28 = sshll.u32 %s1088_s16, 7 }
  0xba   : > { %4787 = vmatmul.mubr.msk.bf16.vlgmr.msra.gmra.mxu1 %vm1269_vm1, %v6150_v44  ;;  %4813 = vmatpush3.bf16.msra.mxu0 %v1296_v39  ;;  %v5264_v48 = vld [vmem:[%s6136_s23 + $0x38] sm:$0xff]   ;;  %v5265_v50 = vld [vmem:[%s6136_s23 + $0x40] sm:$0xff]   ;;  %v5268_v52 = vld [vmem:[%s6136_s23 + $0x88] sm:$0xff]   ;;  %s1156_s13 = scalar_lea.vmem %s7389_s0, %s4253_s25  ;;  %s7221_s21 = scalar_lea.vmem [#allocation4], %s4251_s28  }
  0xbb   : > { %4795 = vmatpush3.bf16.msra.mxu1 %v1296_v39  ;;  %4782 = vmatprep.mubr.msk.bf16.mxu0 %vm1269_vm1, %v5261_v45  ;;  %v5270_v53 = vld [vmem:[%s6136_s23 + $0x90] sm:$0xff]   ;;  %v5272_v56 = vld [vmem:[%s6136_s23 + $0x98] sm:$0xff]   ;;  %v5274_v58 = vld [vmem:[%s6136_s23 + $0xa0] sm:$0xff]   ;;  %s3797_s16 = ssub.s32 (%p5769_p5), 25, %s6234_s26  ;;  %s7296_s29 = scalar_lea.vmem (%p5769_p5), %s7401_s12, %s4526_s19  }
  0xbc   : > { %4790 = vmatprep.mubr.msk.bf16.mxu1 %vm1269_vm1, %v5262_v46  ;;  %5030 = vmatprep.subr.msk.bf16.mxu1 %vm1294_vm0, %v1925_v43  ;;  %v5269_v54 = vld [vmem:[%s6136_s23 + $0x50] sm:$0xff]   ;;  %v5271_v57 = vld [vmem:[%s6136_s23 + $0x58] sm:$0xff]   ;;  %v5273_v59 = vld [vmem:[%s6136_s23 + $0x60] sm:$0xff]   ;;  %p3798_p0 = scmp.lt.s32.totalorder (%p5769_p5), %s3797_s16, 16 }
  0xbd   : > { %5031 = vmatprep.subr.msk.bf16.mxu0 %vm1294_vm0, %v1925_v43  ;;  %v5276_v60 = vld [vmem:[%s6136_s23 + $0xa8] sm:$0xff]   ;;  %v5278_v62 = vld [vmem:[%s6136_s23 + $0xb0] sm:$0xff]   ;;  %v5280_v0 = vld [vmem:[%s6136_s23 + $0xb8] sm:$0xff]  }
  0xbe   : > { %v5275_v61 = vld [vmem:[%s6136_s23 + $0x68] sm:$0xff]   ;;  %v5277_v63 = vld [vmem:[%s6136_s23 + $0x70] sm:$0xff]   ;;  %v5279_v1 = vld [vmem:[%s6136_s23 + $0x78] sm:$0xff]  }
  0xbf   : > { %v5282_v6 = vld [vmem:[%s1156_s13] sm:$0xff]   ;;  %v5283_v7 = vld [vmem:[%s1156_s13 + $0x8] sm:$0xff]   ;;  %v5284_v8 = vld [vmem:[%s1156_s13 + $0x10] sm:$0xff]  }
  0xc0   : > { %v5285_v9 = vld [vmem:[%s1156_s13 + $0x18] sm:$0xff]   ;;  %v5286_v10 = vld [vmem:[%s1156_s13 + $0x20] sm:$0xff]   ;;  %v5287_v11 = vld [vmem:[%s1156_s13 + $0x28] sm:$0xff]  }
  0xc1   : > { %4783 = vmatmul.mubr.msk.bf16.gmra.mxu0 %vm1269_vm1, %v5263_v47  ;;  %v5288_v12 = vld [vmem:[%s1156_s13 + $0x30] sm:$0xff]   ;;  %v5289_v13 = vld [vmem:[%s1156_s13 + $0x38] sm:$0xff]  }
  0xc2   : > { %4791 = vmatmul.mubr.msk.bf16.gmra.mxu1 %vm1269_vm1, %v5264_v48  ;;  %4814 = vmatprep.mubr.msk.bf16.mxu0 %vm1269_vm1, %v5266_v49 }
  0xc3   : > { %4796 = vmatprep.mubr.msk.bf16.mxu1 %vm1269_vm1, %v5265_v50 }
  0xc9   : > { %4815 = vmatmul.mubr.msk.bf16.vlgmr.msra.gmra.mxu0 %vm1269_vm1, %v5268_v52 }
  0xca   : > { %4797 = vmatmul.mubr.msk.bf16.vlgmr.msra.gmra.mxu1 %vm1269_vm1, %v5267_v51  ;;  %4818 = vmatprep.mubr.msk.bf16.mxu0 %vm1269_vm1, %v5270_v53 }
  0xcb   : > { %4831 = vmatpush3.bf16.msra.mxu1 %v1927_v55  ;;  %4800 = vmatprep.mubr.msk.bf16.mxu1 %vm1269_vm1, %v5269_v54 }
  0xcc   : > { %4849 = vmatpush3.bf16.msra.mxu0 %v1927_v55  ;;  %5032 = vmatprep.subr.msk.bf16.mxu1 %vm1294_vm0, %v1925_v43 }
  0xcd   : > { %5033 = vmatprep.subr.msk.bf16.mxu0 %vm1294_vm0, %v2424_v2 }
  0xd1   : > { %4819 = vmatmul.mubr.msk.bf16.gmra.mxu0 %vm1269_vm1, %v5272_v56 }
  0xd2   : > { %4801 = vmatmul.mubr.msk.bf16.gmra.mxu1 %vm1269_vm1, %v5271_v57  ;;  %4822 = vmatprep.mubr.msk.bf16.mxu0 %vm1269_vm1, %v5274_v58 }
  0xd3   : > { %4804 = vmatprep.mubr.msk.bf16.mxu1 %vm1269_vm1, %v5273_v59 }
  0xd9   : > { %4823 = vmatmul.mubr.msk.bf16.gmra.mxu0 %vm1269_vm1, %v5276_v60 }
  0xda   : > { %4805 = vmatmul.mubr.msk.bf16.gmra.mxu1 %vm1269_vm1, %v5275_v61  ;;  %4826 = vmatprep.mubr.msk.bf16.mxu0 %vm1269_vm1, %v5278_v62 }
  0xdb   : > { %4808 = vmatprep.mubr.msk.bf16.mxu1 %vm1269_vm1, %v5277_v63 }
  0xe1   : > { %4827 = vmatmul.mubr.msk.bf16.gmra.mxu0 %vm1269_vm1, %v5280_v0 }
  0xe2   : > { %4809 = vmatmul.mubr.msk.bf16.gmra.mxu1 %vm1269_vm1, %v5279_v1  ;;  %4850 = vmatprep.mubr.msk.bf16.mxu0 %vm1269_vm1, %v5265_v50 }
  0xe3   : > { %4832 = vmatprep.mubr.msk.bf16.mxu1 %vm1269_vm1, %v5257_v40 }
  0xe9   : > { %4851 = vmatmul.mubr.msk.bf16.vlgmr.msra.gmra.mxu0 %vm1269_vm1, %v5267_v51 }
  0xea   : > { %4833 = vmatmul.mubr.msk.bf16.vlgmr.msra.gmra.mxu1 %vm1269_vm1, %v5259_v42  ;;  %4854 = vmatprep.mubr.msk.bf16.mxu0 %vm1269_vm1, %v5269_v54 }
  0xeb   : > { %4867 = vmatpush3.bf16.msra.mxu1 %v1927_v55  ;;  %4836 = vmatprep.mubr.msk.bf16.mxu1 %vm1269_vm1, %v5261_v45 }
  0xec   : > { %4885 = vmatpush3.bf16.msra.mxu0 %v2450_v3  ;;  %4902 = vmatprep.subr.bf16.mxu1 %v5281_v4 }
  0xed   : > { %4920 = vmatprep.subr.msk.mxu0 %vm2768_vm2, %v6241_v5 }
  0xf1   : > { %4855 = vmatmul.mubr.msk.bf16.gmra.mxu0 %vm1269_vm1, %v5271_v57 }
  0xf2   : > { %4837 = vmatmul.mubr.msk.bf16.gmra.mxu1 %vm1269_vm1, %v5263_v47  ;;  %4858 = vmatprep.mubr.msk.bf16.mxu0 %vm1269_vm1, %v5273_v59 }
  0xf3   : > { %4840 = vmatprep.mubr.msk.bf16.mxu1 %vm1269_vm1, %v6140_v41 }
  0xf9   : > { %4859 = vmatmul.mubr.msk.bf16.gmra.mxu0 %vm1269_vm1, %v5275_v61 }
  0xfa   : > { %4841 = vmatmul.mubr.msk.bf16.gmra.mxu1 %vm1269_vm1, %v6150_v44  ;;  %4862 = vmatprep.mubr.msk.bf16.mxu0 %vm1269_vm1, %v5277_v63 }
  0xfb   : > { %4844 = vmatprep.mubr.msk.bf16.mxu1 %vm1269_vm1, %v5262_v46 }
 0x101   : > { %4863 = vmatmul.mubr.msk.bf16.gmra.mxu0 %vm1269_vm1, %v5279_v1 }
 0x102   : > { %4845 = vmatmul.mubr.msk.bf16.gmra.mxu1 %vm1269_vm1, %v5264_v48 }
 0x103   : > { %4868 = vmatprep.mubr.msk.bf16.mxu1 %vm1269_vm1, %v5266_v49 }
 0x10a   : > { %4869 = vmatmul.mubr.msk.bf16.vlgmr.msra.gmra.mxu1 %vm1269_vm1, %v5268_v52 }
 0x10b   : > { %4872 = vmatprep.mubr.msk.bf16.mxu1 %vm1269_vm1, %v5270_v53  ;;  %4903 = vmatpush3.bf16.msra.mxu1 %v5281_v4 }
 0x112   : > { %4873 = vmatmul.mubr.msk.bf16.gmra.mxu1 %vm1269_vm1, %v5272_v56 }
 0x113   : > { %4876 = vmatprep.mubr.msk.bf16.mxu1 %vm1269_vm1, %v5274_v58 }
 0x11a   : > { %4877 = vmatmul.mubr.msk.bf16.gmra.mxu1 %vm1269_vm1, %v5276_v60 }
 0x11b   : > { %4880 = vmatprep.mubr.msk.bf16.mxu1 %vm1269_vm1, %v5278_v62 }
 0x122   : > { %4881 = vmatmul.mubr.msk.bf16.gmra.mxu1 %vm1269_vm1, %v5280_v0 }
 0x123   : > { %4904 = vmatprep.mubr.msk.bf16.mxu1 %vm2595_vm3, %v5282_v6 }
 0x12a   : > { %4905 = vmatmul.mubr.msk.bf16.vlgmr.msra.gmra.mxu1 %vm2595_vm3, %v5283_v7 }
 0x12b   : > { %4908 = vmatprep.mubr.msk.bf16.mxu1 %vm2595_vm3, %v5284_v8 }
 0x132   : > { %4909 = vmatmul.mubr.msk.bf16.gmra.mxu1 %vm2595_vm3, %v5285_v9 }
 0x133   : > { %4912 = vmatprep.mubr.msk.bf16.mxu1 %vm2595_vm3, %v5286_v10 }
 0x13a   : > { %4913 = vmatmul.mubr.msk.bf16.gmra.mxu1 %vm2595_vm3, %v5287_v11 }
 0x13b   : > { %4916 = vmatprep.mubr.msk.bf16.mxu1 %vm2595_vm3, %v5288_v12 }
 0x142   : > { %4917 = vmatmul.mubr.msk.bf16.gmra.mxu1 %vm2595_vm3, %v5289_v13 }
 0x179   : > { %v6256_v14 = vpop.f32.mrf.mxu0 }
 0x17a   : > { %7460 = vst [vmem:[#allocation7_spill] sm:$0xff] %v6256_v14  ;;  %v6258_v15 = vpop.f32.mrf.mxu1  ;;  %v1719_v40 = vmul.f32 %v6256_v14, %v6256_v14 }
 0x17b   : > { %7461 = vst [vmem:[#allocation8_spill] sm:$0xff] %v6258_v15  ;;  %v6260_v16 = vpop.f32.mrf.mxu0 }
 0x17c   : > { %7462 = vst [vmem:[#allocation9_spill] sm:$0xff] %v6260_v16  ;;  %v6262_v17 = vpop.f32.mrf.mxu1  ;;  %v1717_v45 = vmul.f32 %v6260_v16, %v6260_v16 }
 0x17d   : > { %7463 = vst [vmem:[#allocation10_spill] sm:$0xff] %v6262_v17  ;;  %v6264_v18 = vpop.f32.mrf.mxu0 }
 0x17e   : > { %7464 = vst [vmem:[#allocation11_spill] sm:$0xff] %v6264_v18  ;;  %v6268_v20 = vpop.f32.mrf.mxu1  ;;  %v1720_v52 = vmul.f32 %v6264_v18, %v6264_v18 }
 0x17f   : > { %7465 = vst [vmem:[#allocation12_spill] sm:$0xff] %v6268_v20  ;;  %v6272_v22 = vpop.f32.mrf.mxu0 }
 0x180   : > { %7466 = vst [vmem:[#allocation13_spill] sm:$0xff] %v6272_v22  ;;  %v6276_v24 = vpop.f32.mrf.mxu1  ;;  %v1718_v1 = vmul.f32 %v6272_v22, %v6272_v22 }
 0x181   : > { %7467 = vst [vmem:[#allocation14_spill] sm:$0xff] %v6276_v24  ;;  %v6280_v26 = vpop.f32.mrf.mxu0 }
 0x182   : > { %7468 = vst [vmem:[#allocation15_spill] sm:$0xff] %v6280_v26  ;;  %v6282_v27 = vpop.f32.mrf.mxu1 }
 0x183   : > { %7469 = vst [vmem:[#allocation16_spill] sm:$0xff] %v6282_v27  ;;  %v6284_v28 = vpop.f32.mrf.mxu0 }
 0x184   : > { %7470 = vst [vmem:[#allocation17_spill] sm:$0xff] %v6284_v28  ;;  %v6286_v29 = vpop.f32.mrf.mxu1  ;;  %v1721_v10 = vmul.f32 %v6284_v28, %v6284_v28 }
 0x185   : > { %7471 = vst [vmem:[#allocation18_spill] sm:$0xff] %v6286_v29  ;;  %v6288_v30 = vpop.f32.mrf.mxu0 }
 0x186   : > { %7472 = vst [vmem:[#allocation19_spill] sm:$0xff] %v6288_v30  ;;  %v6292_v32 = vpop.f32.mrf.mxu1  ;;  %v1724_v37 = vmul.f32 %v6288_v30, %v6288_v30 }
 0x187   : > { %7473 = vst [vmem:[#allocation20_spill] sm:$0xff] %v6292_v32  ;;  %v6296_v34 = vpop.f32.mrf.mxu0  ;;  %v6460_v51 = vmul.f32 %v6292_v32, %v6292_v32 }
 0x188   : > { %7474 = vst [vmem:[#allocation21_spill] sm:$0xff] %v6296_v34  ;;  %v6300_v36 = vpop.f32.mrf.mxu1 }
 0x189   : > { %7475 = vst [vmem:[#allocation22_spill] sm:$0xff] %v6300_v36  ;;  %v6304_v38 = vpop.f32.mrf.mxu0 }
 0x18a   : > { %7476 = vst [vmem:[#allocation23_spill] sm:$0xff] %v6304_v38  ;;  %v6306_v39 = vpop.f32.mrf.mxu1  ;;  %v1767_v43 = vmul.f32 %v6304_v38, %v6304_v38 }
 0x18b   : > { %v1735_v41 = vmul.f32 %v6306_v39, %v6306_v39  ;;  %v6312_v42 = vpop.f32.mrf.mxu0 }
 0x18c   : > { %7477 = vst [vmem:[#allocation24_spill] sm:$0xff] %v6312_v42  ;;  %v6316_v44 = vpop.f32.mrf.mxu1  ;;  %v1765_v48 = vmul.f32 %v6312_v42, %v6312_v42 }
 0x18d   : > { %v1751_v46 = vadd.f32 %v1735_v41, %v1719_v40  ;;  %v1733_v47 = vmul.f32 %v6316_v44, %v6316_v44  ;;  %v6324_v49 = vpop.f32.mrf.mxu0  ;;  %v1723_v41 = vmul.f32 %v6280_v26, %v6280_v26 }
 0x18e   : > { %7478 = vst [vmem:[#allocation25_spill] sm:$0xff] %v6324_v49  ;;  %v6326_v50 = vpop.f32.mrf.mxu1  ;;  %v1768_v62 = vmul.f32 %v6324_v49, %v6324_v49 }
 0x18f   : > { %v1749_v53 = vadd.f32 %v1733_v47, %v1717_v45  ;;  %v1736_v54 = vmul.f32 %v6326_v50, %v6326_v50  ;;  %v6336_v56 = vpop.f32.mrf.mxu0  ;;  %v1783_v57 = vadd.f32 %v1767_v43, %v1751_v46 }
 0x190   : > { %7479 = vst [vmem:[#allocation26_spill] sm:$0xff] %v6336_v56  ;;  %v6338_v58 = vpop.f32.mrf.mxu1  ;;  %v1766_v3 = vmul.f32 %v6336_v56, %v6336_v56 }
 0x191   : > { %v1781_v60 = vadd.f32 %v1765_v48, %v1749_v53  ;;  %v1752_v61 = vadd.f32 %v1736_v54, %v1720_v52  ;;  %v1734_v63 = vmul.f32 %v6338_v58, %v6338_v58  ;;  %v6346_v0 = vpop.f32.mrf.mxu0  ;;  %v6358_v7 = vadd.f32 1e-08, %v1783_v57 }
 0x192   : > { %7480 = vst [vmem:[#allocation27_spill] sm:$0xff] %v6346_v0  ;;  %v6354_v4 = vpop.f32.mrf.mxu1  ;;  %v1722_v57 = vmul.f32 %v6296_v34, %v6296_v34 }
 0x193   : > { %7481 = vst [vmem:[#allocation28_spill] sm:$0xff] %v6354_v4  ;;  %v6356_v6 = vpop.f32.mrf.mxu0  ;;  %v1750_v8 = vadd.f32 %v1734_v63, %v1718_v1  ;;  %v6364_v11 = vadd.f32 1e-08, %v1781_v60  ;;  %v1784_v12 = vadd.f32 %v1768_v62, %v1752_v61  ;;  %v1739_v45 = vmul.f32 %v6354_v4, %v6354_v4  ;;  %v6765_v4 = vld [vmem:[%s6663_s27 + $0x20] sm:$0xff]  }
 0x194   : > { %7482 = vst [vmem:[#allocation29_spill] sm:$0xff] %v6356_v6  ;;  %v6360_v9 = vpop.f32.mrf.mxu1  ;;  %v1769_v48 = vmul.f32 %v6356_v6, %v6356_v6  ;;  %5293 = vrsqrt.f32 %v6358_v7  ;;  %v1771_v61 = vmul.f32 %v6346_v0, %v6346_v0  ;;  %vm1829_vm5 = vcmp.eq.f32.partialorder %v6358_v7, inf }
 0x195   : > { %v1737_v13 = vmul.f32 %v6360_v9, %v6360_v9  ;;  %v6368_v40 = vpop.f32.mrf.mxu0  ;;  %v1782_v43 = vadd.f32 %v1766_v3, %v1750_v8  ;;  %5295 = vrsqrt.f32 %v6364_v11  ;;  %v6394_v63 = vadd.f32 1e-08, %v1784_v12 }
 0x196   : > { %7483 = vst [vmem:[#allocation30_spill] sm:$0xff] %v6368_v40  ;;  %v6374_v46 = vpop.f32.mrf.mxu1  ;;  %v1772_v23 = vmul.f32 %v6368_v40, %v6368_v40  ;;  %vm1815_vm4 = vcmp.eq.f32.partialorder %v6364_v11, inf  ;;  %vm1817_vm6 = vcmp.eq.f32.partialorder %v6364_v11, 0.0  ;;  %vm1831_vm10 = vcmp.eq.f32.partialorder %v6358_v7, 0.0 }
 0x197   : > { %7484 = vst [vmem:[#allocation31_spill] sm:$0xff] %v6374_v46  ;;  %v1753_v47 = vadd.f32 %v1737_v13, %v1721_v10  ;;  %v6382_v54 = vpop.f32.mrf.mxu0  ;;  %v6387_v60 = vadd.f32 1e-08, %v1782_v43  ;;  %v1740_v1 = vmul.f32 %v6374_v46, %v6374_v46  ;;  %v1755_v10 = vadd.f32 %v1739_v45, %v1723_v41 }
 0x198   : > { %7485 = vst [vmem:[#allocation32_spill] sm:$0xff] %v6382_v54  ;;  %v6391_v62 = vpop.f32.mrf.mxu1  ;;  %v1770_v43 = vmul.f32 %v6382_v54, %v6382_v54  ;;  %v1727_v41 = vmul.f32 %v6258_v15, %v6258_v15  ;;  %v1725_v45 = vmul.f32 %v6262_v17, %v6262_v17  ;;  %vm1836_vm7 = vcmp.eq.f32.partialorder %v6394_v63, inf }
 0x199   : > { %v1738_v3 = vmul.f32 %v6391_v62, %v6391_v62  ;;  %v6400_v8 = vpop.f32.mrf.mxu0  ;;  %v1785_v21 = vadd.f32 %v1769_v48, %v1753_v47  ;;  %5297 = vrsqrt.f32 %v6387_v60  ;;  %v1756_v19 = vadd.f32 %v1740_v1, %v1724_v37 }
 0x19a   : > { %7486 = vst [vmem:[#allocation33_spill] sm:$0xff] %v6400_v8  ;;  %v6408_v12 = vpop.f32.mrf.mxu1  ;;  %5299 = vrsqrt.f32 %v6394_v63  ;;  %vm1822_vm8 = vcmp.eq.f32.partialorder %v6387_v60, inf  ;;  %v1825_v40 = vand.u32 2147483648, %v6387_v60  ;;  %vm1824_vm9 = vcmp.eq.f32.partialorder %v6387_v60, 0.0 }
 0x19b   : > { %7487 = vst [vmem:[#allocation34_spill] sm:$0xff] %v6408_v12  ;;  %v1754_v25 = vadd.f32 %v1738_v3, %v1722_v57  ;;  %v6412_v31 = vpop.f32.mrf.mxu0  ;;  %v1728_v57 = vmul.f32 %v6268_v20, %v6268_v20  ;;  %v1787_v3 = vadd.f32 %v1771_v61, %v1755_v10  ;;  %v6434_v59 = vadd.f32 1e-08, %v1785_v21 }
 0x19c   : > { %7488 = vst [vmem:[#allocation35_spill] sm:$0xff] %v6412_v31  ;;  %v6419_v35 = vpop.f32.mrf.mxu1  ;;  %v1743_v37 = vmul.f32 %v6408_v12, %v6408_v12  ;;  %v1773_v52 = vmul.f32 %v6412_v31, %v6412_v31  ;;  %v1726_v61 = vmul.f32 %v6276_v24, %v6276_v24  ;;  %v1788_v55 = vadd.f32 %v1772_v23, %v1756_v19 }
 0x19d   : > { %7489 = vst [vmem:[#allocation36_spill] sm:$0xff] %v6419_v35  ;;  %v1741_v47 = vmul.f32 %v6419_v35, %v6419_v35  ;;  %v6426_v48 = vpop.f32.mrf.mxu0  ;;  %v1786_v53 = vadd.f32 %v1770_v43, %v1754_v25  ;;  %v6464_v10 = vadd.f32 1e-08, %v1787_v3  ;;  %5301 = vrsqrt.f32 %v6434_v59  ;;  %v4642_v35 = vld [vmem:[%s6663_s27 + $0x90] sm:$0xff]  }
 0x19e   : > { %7490 = vst [vmem:[#allocation37_spill] sm:$0xff] %v6426_v48  ;;  %v6430_v33 = vpop.f32.mrf.mxu1  ;;  %v1775_v19 = vmul.f32 %v6400_v8, %v6400_v8  ;;  %v6488_v30 = vadd.f32 1e-08, %v1788_v55  ;;  %vm1838_vm11 = vcmp.eq.f32.partialorder %v6394_v63, 0.0  ;;  %vm1843_vm12 = vcmp.eq.f32.partialorder %v6434_v59, inf }
 0x19f   : > { %7491 = vst [vmem:[#allocation38_spill] sm:$0xff] %v6430_v33  ;;  %v1757_v1 = vadd.f32 %v1741_v47, %v1725_v45  ;;  %v6440_v13 = vpop.f32.mrf.mxu0  ;;  %v1744_v25 = vmul.f32 %v6430_v33, %v6430_v33  ;;  %v6454_v45 = vmul.f32 %v6282_v27, %v6282_v27  ;;  %v1729_v47 = vmul.f32 %v6286_v29, %v6286_v29 }
 0x1a0   : > { %7492 = vst [vmem:[#allocation39_spill] sm:$0xff] %v6440_v13  ;;  %v6448_v21 = vpop.f32.mrf.mxu1  ;;  %v6466_v15 = vadd.f32 1e-08, %v1786_v53  ;;  %v1759_v29 = vadd.f32 %v1743_v37, %v1727_v41  ;;  %v1776_v53 = vmul.f32 %v6426_v48, %v6426_v48  ;;  %v1774_v24 = vmul.f32 %v6440_v13, %v6440_v13 }
 0x1a1   : > { %7493 = vst [vmem:[#allocation40_spill] sm:$0xff] %v6448_v21  ;;  %v6462_v2 = vpop.f32.mrf.mxu0  ;;  %v1742_v43 = vmul.f32 %v6448_v21, %v6448_v21  ;;  %v1789_v23 = vadd.f32 %v1773_v52, %v1757_v1  ;;  %v1760_v3 = vadd.f32 %v1744_v25, %v1728_v57  ;;  %v5294_v26 = vpop.eup %5293  ;;  %v1730_v41 = vmul.f32 %v6300_v36, %v6300_v36 }
 0x1a2   : > { %7494 = vst [vmem:[#allocation41_spill] sm:$0xff] %v6462_v2  ;;  %v6472_v20 = vpop.f32.mrf.mxu1  ;;  %v5296_v57 = vpop.eup %5295  ;;  %5303 = vrsqrt.f32 %v6466_v15  ;;  %v1791_v55 = vadd.f32 %v1775_v19, %v1759_v29  ;;  %v1818_v1 = vand.u32 2147483648, %v6364_v11  ;;  %vm1850_vm13 = vcmp.eq.f32.partialorder %v6466_v15, inf }
 0x1a3   : > { %7495 = vst [vmem:[#allocation42_spill] sm:$0xff] %v6472_v20  ;;  %v6477_v32 = vpop.f32.mrf.mxu0  ;;  %v1758_v17 = vadd.f32 %v1742_v43, %v1726_v61  ;;  %5305 = vrsqrt.f32 %v6464_v10  ;;  %v6503_v37 = vadd.f32 1e-08, %v1789_v23  ;;  %v1792_v28 = vadd.f32 %v1776_v53, %v1760_v3 }
 0x1a4   : > { %7496 = vst [vmem:[#allocation43_spill] sm:$0xff] %v6477_v32  ;;  %v6483_v27 = vpop.f32.mrf.mxu1  ;;  %v1828_v23 = vmul.f32 %v5294_v26, %v6358_v7  ;;  %5307 = vrsqrt.f32 %v6488_v30  ;;  %v1814_v16 = vmul.f32 %v5296_v57, %v6364_v11  ;;  %v1777_v53 = vmul.f32 %v6477_v32, %v6477_v32 }
 0x1a5   : > { %7497 = vst [vmem:[#allocation44_spill] sm:$0xff] %v6483_v27  ;;  %v6490_v52 = vpop.f32.mrf.mxu0  ;;  %v1745_v61 = vmul.f32 %v6483_v27, %v6483_v27  ;;  %v1790_v34 = vadd.f32 %v1774_v24, %v1758_v17  ;;  %v1747_v17 = vmul.f32 %v6472_v20, %v6472_v20  ;;  %v6531_v22 = vadd.f32 1e-08, %v1791_v55 }
 0x1a6   : > { %7498 = vst [vmem:[#allocation45_spill] sm:$0xff] %v6490_v52  ;;  %v6497_v25 = vpop.f32.mrf.mxu1  ;;  %v5298_v19 = vpop.eup %5297  ;;  %v1779_v57 = vmul.f32 %v6462_v2, %v6462_v2  ;;  %5309 = vrsqrt.f32 %v6503_v37  ;;  %v1816_v31 = vsel %vm1815_vm4, %v6364_v11, %v1814_v16  ;;  %vm1845_vm14 = vcmp.eq.f32.partialorder %v6434_v59, 0.0 }
 0x1a7   : > { %7499 = vst [vmem:[#allocation46_spill] sm:$0xff] %v6497_v25  ;;  %v6505_v36 = vpop.f32.mrf.mxu0  ;;  %v5300_v3 = vpop.eup %5299  ;;  %v1761_v24 = vadd.f32 %v1745_v61, %v1729_v47  ;;  %v1748_v8 = vmul.f32 %v6497_v25, %v6497_v25  ;;  %v6539_v47 = vadd.f32 1e-08, %v1792_v28  ;;  %v6541_v61 = vadd.f32 1e-08, %v1790_v34 }
 0x1a8   : > { %7500 = vst [vmem:[#allocation47_spill] sm:$0xff] %v6505_v36  ;;  %v6512_v14 = vpop.f32.mrf.mxu1  ;;  %v1821_v32 = vmul.f32 %v5298_v19, %v6387_v60  ;;  %v1835_v55 = vmul.f32 %v5300_v3, %v6394_v63  ;;  %v1778_v2 = vmul.f32 %v6505_v36, %v6505_v36  ;;  %v1763_v13 = vadd.f32 %v1747_v17, %v6454_v45 }
 0x1a9   : > { %7501 = vst [vmem:[#allocation48_spill] sm:$0xff] %v6512_v14  ;;  %v1746_v18 = vmul.f32 %v6512_v14, %v6512_v14  ;;  %v6529_v26 = vpop.f32.mrf.mxu0  ;;  %v1793_v28 = vadd.f32 %v1777_v53, %v1761_v24  ;;  %5311 = vrsqrt.f32 %v6531_v22  ;;  %v1819_v45 = vsel %vm1817_vm6, %v1818_v1, %v1816_v31 }
 0x1aa   : > { %v6527_v43 = vpop.f32.mrf.mxu1  ;;  %v1823_v34 = vsel %vm1822_vm8, %v6387_v60, %v1821_v32  ;;  %v5302_v16 = vpop.eup %5301  ;;  %5313 = vrsqrt.f32 %v6541_v61  ;;  %v1830_v3 = vsel %vm1829_vm5, %v6358_v7, %v1828_v23  ;;  %v1837_v60 = vsel %vm1836_vm7, %v6394_v63, %v1835_v55 }
 0x1ab   : > { %v1762_v48 = vadd.f32 %v1746_v18, %v1730_v41  ;;  %v6553_v0 = vpop.f32.mrf.mxu0  ;;  %v1764_v18 = vadd.f32 %v1748_v8, %v6460_v51  ;;  %v1780_v41 = vmul.f32 %v6490_v52, %v6490_v52  ;;  %v1826_v32 = vsel %vm1824_vm9, %v1825_v40, %v1823_v34 }
 0x1ac   : > { %v6543_v29 = vpop.f32.mrf.mxu1  ;;  %5315 = vrsqrt.f32 %v6539_v47  ;;  %v2416_v8 = vpack.c.bf16 %v1826_v32, %v1819_v45  ;;  %v1795_v24 = vadd.f32 %v1779_v57, %v1763_v13  ;;  %v6576_v53 = vadd.f32 1e-08, %v1793_v28 }
 0x1ad   : > { %v1794_v51 = vadd.f32 %v1778_v2, %v1762_v48  ;;  %v6578_v11 = vpop.f32.mrf.mxu0  ;;  %v1796_v1 = vadd.f32 %v1780_v41, %v1764_v18  ;;  %v7502_v2 = vand.u32 2147483648, %v6358_v7  ;;  %v7503_v23 = vand.u32 2147483648, %v6394_v63  ;;  %v2717_v18 = vld [vmem:[%s7396_s7] sm:$0xff] }
 0x1ae   : > { %v6557_v19 = vpop.f32.mrf.mxu1  ;;  %4886 = vmatprep.mubr.msk.bf16.mxu0 %vm1269_vm1, %v2416_v8  ;;  %v1842_v57 = vmul.f32 %v5302_v16, %v6434_v59  ;;  %v6598_v7 = vadd.f32 1e-08, %v1795_v24  ;;  %5317 = vrsqrt.f32 %v6576_v53  ;;  %v1853_v24 = vand.u32 2147483648, %v6466_v15 }
 0x1af   : > { %v5304_v40 = vpop.eup %5303  ;;  %v1833_v48 = vsel %vm1831_vm10, %v7502_v2, %v1830_v3  ;;  %v1840_v13 = vsel %vm1838_vm11, %v7503_v23, %v1837_v60  ;;  %v6592_v45 = vadd.f32 1e-08, %v1794_v51  ;;  %v6602_v63 = vpop.f32.mrf.mxu0  ;;  %v6611_v51 = vld [vmem:[%s7400_s11 + $0x4] sm:$0xf]  ;;  %v6613_v8 = vadd.f32 1e-08, %v1796_v1 }
 0x1b0   : > { %v6570_v17 = vpop.f32.mrf.mxu1  ;;  %v5306_v55 = vpop.eup %5305  ;;  %v2417_v28 = vpack.c.bf16 %v1840_v13, %v1833_v48  ;;  %v1844_v16 = vsel %vm1843_vm12, %v6434_v59, %v1842_v57  ;;  %v1849_v32 = vmul.f32 %v5304_v40, %v6466_v15  ;;  %v1846_v60 = vand.u32 2147483648, %v6434_v59 }
 0x1b1   : > { %v5308_v41 = vpop.eup %5307  ;;  %vm1852_vm15 = vcmp.eq.f32.partialorder %v6466_v15, 0.0  ;;  %v1856_v2 = vmul.f32 %v5306_v55, %v6464_v10  ;;  %5319 = vrsqrt.f32 %v6592_v45  ;;  %vm1857_vm3 = vcmp.eq.f32.partialorder %v6464_v10, inf }
 0x1b2   : > { %v6582_v31 = vpop.f32.mrf.mxu1  ;;  %4887 = vmatmul.mubr.msk.bf16.vlgmr.msra.gmra.mxu0 %vm1269_vm1, %v2417_v28  ;;  %v1851_v40 = vsel %vm1850_vm13, %v6466_v15, %v1849_v32  ;;  %v1847_v23 = vsel %vm1845_vm14, %v1846_v60, %v1844_v16  ;;  %v1863_v15 = vmul.f32 %v5308_v41, %v6488_v30  ;;  %5321 = vrsqrt.f32 %v6598_v7 }
 0x1b3   : > { %4921 = vmatpush3.msk.msra.mxu0 %vm2768_vm2, %v6241_v5  ;;  %v5310_v1 = vpop.eup %5309  ;;  %v1854_v13 = vsel %vm1852_vm15, %v1853_v24, %v1851_v40  ;;  %v6628_v5 = vpop.f32.mrf.mxu0  ;;  %v1858_v57 = vsel %vm1857_vm3, %v6464_v10, %v1856_v2  ;;  %v1860_v55 = vand.u32 2147483648, %v6464_v10  ;;  %vm1864_vm2 = vcmp.eq.f32.partialorder %v6488_v30, inf }
 0x1b4   : > { %v6590_v34 = vpop.f32.mrf.mxu1  ;;  %4922 = vmatprep.subr.mxu0 %v2717_v18  ;;  %v2418_v59 = vpack.c.bf16 %v1854_v13, %v1847_v23  ;;  %vm1859_vm4 = vcmp.eq.f32.partialorder %v6464_v10, 0.0  ;;  %v1865_v41 = vsel %vm1864_vm2, %v6488_v30, %v1863_v15  ;;  %vm1866_vm5 = vcmp.eq.f32.partialorder %v6488_v30, 0.0 }
 0x1b5   : > { %4923 = vmatpush3.msra.mxu0 %v2717_v18  ;;  %v1867_v18 = vand.u32 2147483648, %v6488_v30  ;;  %5323 = vrsqrt.f32 %v6613_v8  ;;  %v1861_v24 = vsel %vm1859_vm4, %v1860_v55, %v1858_v57  ;;  %v1870_v2 = vmul.f32 %v5310_v1, %v6503_v37  ;;  %v6648_v13 = vpop.f32.mrf.mxu0 }
 0x1b6   : > { %v6606_v3 = vpop.f32.mrf.mxu1  ;;  %5035 = vmatprep.subr.msk.bf16.mxu0 %vm1294_vm0, %v6611_v51  ;;  %v5312_v16 = vpop.eup %5311  ;;  %4890 = vmatprep.mubr.msk.bf16.mxu0 %vm1269_vm1, %v2418_v59  ;;  %vm1871_vm6 = vcmp.eq.f32.partialorder %v6503_v37, inf  ;;  %v1874_v57 = vand.u32 2147483648, %v6503_v37  ;;  %vm1878_vm7 = vcmp.eq.f32.partialorder %v6541_v61, inf  ;;  %v1881_v1 = vand.u32 2147483648, %v6541_v61 }
 0x1b7   : > { %v5314_v60 = vpop.eup %5313  ;;  %v1868_v40 = vsel %vm1866_vm5, %v1867_v18, %v1865_v41  ;;  %v1872_v30 = vsel %vm1871_vm6, %v6503_v37, %v1870_v2  ;;  %v1884_v55 = vmul.f32 %v5312_v16, %v6531_v22  ;;  %v6666_v18 = vld [vmem:[%s6663_s27 + $0x40] sm:$0xff]   ;;  %v6668_v41 = vpop.f32.mrf.mxu0  ;;  %vm1873_vm8 = vcmp.eq.f32.partialorder %v6503_v37, 0.0 }
 0x1b8   : > { %v6624_v48 = vpop.f32.mrf.mxu1  ;;  %v2419_v59 = vpack.c.bf16 %v1868_v40, %v1861_v24  ;;  %v1877_v10 = vmul.f32 %v5314_v60, %v6541_v61  ;;  %vm1880_vm9 = vcmp.eq.f32.partialorder %v6541_v61, 0.0  ;;  %v6676_v2 = vld [vmem:[%s6663_s27] sm:$0xff]   ;;  %v1875_v16 = vsel %vm1873_vm8, %v1874_v57, %v1872_v30 }
 0x1b9   : > { %v5316_v23 = vpop.eup %5315  ;;  %vm1885_vm10 = vcmp.eq.f32.partialorder %v6531_v22, inf  ;;  %vm1892_vm11 = vcmp.eq.f32.partialorder %v6539_v47, inf  ;;  %v1888_v38 = vand.u32 2147483648, %v6531_v22  ;;  %v1895_v57 = vand.u32 2147483648, %v6539_v47 }
 0x1ba   : > { %v6632_v28 = vpop.f32.mrf.mxu1  ;;  %4891 = vmatmul.mubr.msk.bf16.gmra.mxu0 %vm1269_vm1, %v2419_v59  ;;  %v1879_v60 = vsel %vm1878_vm7, %v6541_v61, %v1877_v10  ;;  %v1891_v36 = vmul.f32 %v5316_v23, %v6539_v47  ;;  %v1886_v54 = vsel %vm1885_vm10, %v6531_v22, %v1884_v55  ;;  %v6685_v61 = vld [vmem:[%s6663_s27 + $0x8] sm:$0xff]   ;;  %v4563_v10 = vunpack.c.l.bf16 %v6666_v18 }
 0x1bb   : > { %v5318_v40 = vpop.eup %5317  ;;  %v1882_v59 = vsel %vm1880_vm9, %v1881_v1, %v1879_v60  ;;  %v4531_v23 = vunpack.c.l.bf16 %v6676_v2  ;;  %v6692_v60 = vpop.f32.mrf.mxu0  ;;  %vm1887_vm12 = vcmp.eq.f32.partialorder %v6531_v22, 0.0  ;;  %vm1894_vm13 = vcmp.eq.f32.partialorder %v6539_v47, 0.0 }
 0x1bc   : > { %v6644_v32 = vpop.f32.mrf.mxu1  ;;  %v2420_v6 = vpack.c.bf16 %v1882_v59, %v1875_v16  ;;  %v1893_v30 = vsel %vm1892_vm11, %v6539_v47, %v1891_v36  ;;  %v6700_v16 = vld [vmem:[%s6663_s27 + $0x80] sm:$0xff]   ;;  %v1889_v59 = vsel %vm1887_vm12, %v1888_v38, %v1886_v54  ;;  %v1898_v36 = vmul.f32 %v5318_v40, %v6576_v53 }
 0x1bd   : > { %v1896_v49 = vsel %vm1894_vm13, %v1895_v57, %v1893_v30  ;;  %v4532_v20 = vunpack.c.h.bf16 %v6676_v2  ;;  %vm1899_vm14 = vcmp.eq.f32.partialorder %v6576_v53, inf  ;;  %v2301_v22 = vmul.f32 %v4563_v10, %v6553_v0  ;;  %v6713_v30 = vpop.f32.mrf.mxu0 }
 0x1be   : > { %v6650_v52 = vpop.f32.mrf.mxu1  ;;  %v5320_v1 = vpop.eup %5319  ;;  %4894 = vmatprep.mubr.msk.bf16.mxu0 %vm1269_vm1, %v2420_v6  ;;  %v2421_v25 = vpack.c.bf16 %v1896_v49, %v1889_v59  ;;  %v1900_v47 = vsel %vm1899_vm14, %v6576_v53, %v1898_v36  ;;  %v4595_v38 = vunpack.c.l.bf16 %v6700_v16  ;;  %v2252_v40 = vmul.f32 %v4531_v23, %v6543_v29  ;;  %v4633_v59 = vld [vmem:[%s6663_s27 + $0x48] sm:$0xff]  }
 0x1bf   : > { %v5322_v42 = vpop.eup %5321  ;;  %v1905_v27 = vmul.f32 %v5320_v1, %v6592_v45  ;;  %v1902_v49 = vand.u32 2147483648, %v6576_v53  ;;  %vm1906_vm15 = vcmp.eq.f32.partialorder %v6592_v45, inf  ;;  %v1909_v0 = vand.u32 2147483648, %v6592_v45 }
 0x1c0   : > { %v6656_v15 = vpop.f32.mrf.mxu1  ;;  %vm1901_vm3 = vcmp.eq.f32.partialorder %v6576_v53, 0.0  ;;  %vm1908_vm2 = vcmp.eq.f32.partialorder %v6592_v45, 0.0  ;;  %v1912_v29 = vmul.f32 %v5322_v42, %v6598_v7  ;;  %v4564_v57 = vunpack.c.h.bf16 %v6666_v18  ;;  %v6731_v42 = vpop.f32.mrf.mxu0 }
 0x1c1   : > { %v1907_v10 = vsel %vm1906_vm15, %v6592_v45, %v1905_v27  ;;  %vm1913_vm4 = vcmp.eq.f32.partialorder %v6598_v7, inf  ;;  %v4596_v45 = vunpack.c.h.bf16 %v6700_v16  ;;  %v2317_v56 = vadd.f32 %v2301_v22, %v2252_v40  ;;  %v4641_v22 = vld [vmem:[%s6663_s27 + $0x88] sm:$0xff]  }
 0x1c2   : > { %v6673_v24 = vpop.f32.mrf.mxu1  ;;  %v5324_v54 = vpop.eup %5323  ;;  %4895 = vmatmul.mubr.msk.bf16.gmra.mxu0 %vm1269_vm1, %v2421_v25  ;;  %v1903_v25 = vsel %vm1901_vm3, %v1902_v49, %v1900_v47  ;;  %v1910_v1 = vsel %vm1908_vm2, %v1909_v0, %v1907_v10  ;;  %v1914_v53 = vsel %vm1913_vm4, %v6598_v7, %v1912_v29  ;;  %v1916_v18 = vand.u32 2147483648, %v6598_v7  ;;  %v4626_v0 = vld [vmem:[%s6663_s27 + $0x10] sm:$0xff]  }
 0x1c3   : > { %v2422_v36 = vpack.c.bf16 %v1910_v1, %v1903_v25  ;;  %v1919_v27 = vmul.f32 %v5324_v54, %v6613_v8  ;;  %vm1920_vm5 = vcmp.eq.f32.partialorder %v6613_v8, inf  ;;  %v1923_v47 = vand.u32 2147483648, %v6613_v8  ;;  %v4634_v10 = vld [vmem:[%s6663_s27 + $0x50] sm:$0xff]  }
 0x1c4   : > { %v6682_v37 = vpop.f32.mrf.mxu1  ;;  %vm1915_vm6 = vcmp.eq.f32.partialorder %v6598_v7, 0.0  ;;  %vm1922_vm7 = vcmp.eq.f32.partialorder %v6613_v8, 0.0  ;;  %v4567_v40 = vunpack.c.l.bf16 %v4633_v59  ;;  %vm2719_vm8 = vcmask 72704  }
 0x1c5   : > { %4898 = vmatprep.mubr.msk.bf16.mxu0 %vm1269_vm1, %v2422_v36  ;;  %v1921_v16 = vsel %vm1920_vm5, %v6613_v8, %v1919_v27  ;;  %v1917_v29 = vsel %vm1915_vm6, %v1916_v18, %v1914_v53  ;;  %v2253_v14 = vmul.f32 %v4532_v20, %v6570_v17  ;;  %v2302_v12 = vmul.f32 %v4564_v57, %v6602_v63  ;;  %v6746_v36 = vld [vmem:[%s6663_s27 + $0x18] sm:$0xff]   ;;  %v6749_v8 = vpop.f32.mrf.mxu0 }
 0x1c6   : > { %v6697_v55 = vpop.f32.mrf.mxu1  ;;  %v1924_v25 = vsel %vm1922_vm7, %v1923_v47, %v1921_v16  ;;  %v4539_v27 = vunpack.c.l.bf16 %v4626_v0  ;;  %v4571_v21 = vunpack.c.l.bf16 %v4634_v10  ;;  %v4536_v53 = vunpack.c.h.bf16 %v6685_v61  ;;  %v6755_v47 = vld [vmem:[%s6663_s27 + $0x58] sm:$0xff]  }
 0x1c7   : > { %v2423_v33 = vpack.c.bf16 %v1924_v25, %v1917_v29  ;;  %v4568_v18 = vunpack.c.h.bf16 %v4633_v59  ;;  %v7504_v17 = vunpack.c.l.bf16 %v6685_v61  ;;  %v2303_v63 = vmul.f32 %v6529_v26, %v4567_v40 }
 0x1c8   : > { %v6706_v6 = vpop.f32.mrf.mxu1  ;;  %v4543_v57 = vunpack.c.l.bf16 %v6746_v36  ;;  %v2318_v59 = vadd.f32 %v2302_v12, %v2253_v14  ;;  %v4540_v29 = vunpack.c.h.bf16 %v4626_v0  ;;  %v4572_v25 = vunpack.c.h.bf16 %v4634_v10  ;;  %v4636_v0 = vld [vmem:[%s6663_s27 + $0x60] sm:$0xff]  }
 0x1c9   : > { %v4575_v61 = vunpack.c.l.bf16 %v6755_v47  ;;  %v2305_v26 = vmul.f32 %v4571_v21, %v6648_v13  ;;  %v2255_v14 = vmul.f32 %v6557_v19, %v4536_v53  ;;  %v2304_v12 = vmul.f32 %v6578_v11, %v4568_v18  ;;  %v6784_v19 = vld [vmem:[%s6663_s27 + $0xa0] sm:$0xff]  }
 0x1ca   : > { %v6719_v2 = vpop.f32.mrf.mxu1  ;;  %4899 = vmatmul.mubr.msk.bf16.gmra.mxu0 %vm1269_vm1, %v2423_v33  ;;  %v4600_v33 = vunpack.c.h.bf16 %v4641_v22  ;;  %v4547_v21 = vunpack.c.l.bf16 %v6765_v4  ;;  %v3272_v11 = vsel %vm1294_vm0, %v6611_v51, 0  ;;  %v4548_v51 = vunpack.c.h.bf16 %v6765_v4 }
 0x1cb   : > { %vm3103_vm9 = vcmask 326656  }
 0x1cc   : > { %v2157_v23 = vpop.f32.mrf.mxu1 }
 0x1cd   : > { %v2366_v54 = vmul.f32 %v4595_v38, %v2157_v23  ;;  %v4599_v38 = vunpack.c.l.bf16 %v4641_v22  ;;  %v4643_v22 = vld [vmem:[%s6663_s27 + $0x98] sm:$0xff]  }
 0x1ce   : > { %v4871_v49 = vpop.f32.mrf.mxu1 }
 0x1cf   : > { %v2382_v7 = vadd.f32 %v2366_v54, %v2317_v56  ;;  %v2254_v56 = vmul.f32 %v6527_v43, %v7504_v17  ;;  %v4603_v54 = vunpack.c.l.bf16 %v4642_v35  ;;  %v2256_v43 = vmul.f32 %v4539_v27, %v6590_v34 }
 0x1d0   : > { %v2160_v1 = vpop.f32.mrf.mxu1  ;;  %v2368_v40 = vmul.f32 %v6719_v2, %v4599_v38  ;;  %v4544_v34 = vunpack.c.h.bf16 %v6746_v36  ;;  %v2257_v2 = vmul.f32 %v4540_v29, %v6624_v48  ;;  %v2306_v38 = vmul.f32 %v4572_v25, %v6692_v60  ;;  %v6795_v48 = vld [vmem:[%s7400_s11 + $0x8] sm:$0xf] }
 0x1d1   : > { %v2367_v20 = vmul.f32 %v4596_v45, %v2160_v1  ;;  %4924 = vmatprep.mubr.msk.f32.mxu0 %vm2719_vm8, %v2382_v7  ;;  %v6770_v45 = vpop.f32.mrf.mxu0  ;;  %v4604_v7 = vunpack.c.h.bf16 %v4642_v35  ;;  %v2319_v17 = vadd.f32 %v2303_v63, %v2254_v56  ;;  %v2369_v46 = vmul.f32 %v4871_v49, %v4600_v33  ;;  %v6799_v63 = vld [vmem:[%s6663_s27 + $0x28] sm:$0xff]  }
 0x1d2   : > { %v6751_v23 = vpop.f32.mrf.mxu1  ;;  %v2321_v53 = vadd.f32 %v2305_v26, %v2256_v43  ;;  %v4579_v35 = vunpack.c.l.bf16 %v4636_v0  ;;  %v2320_v60 = vadd.f32 %v2304_v12, %v2255_v14  ;;  %v4576_v49 = vunpack.c.h.bf16 %v6755_v47  ;;  %v4637_v43 = vld [vmem:[%s6663_s27 + $0x68] sm:$0xff]  }
 0x1d3   : > { %v2383_v10 = vadd.f32 %v2367_v20, %v2318_v59  ;;  %v6788_v18 = vpop.f32.mrf.mxu0  ;;  %v2384_v36 = vadd.f32 %v2368_v40, %v2319_v17  ;;  %v4607_v20 = vunpack.c.l.bf16 %v4643_v22  ;;  %v2307_v59 = vmul.f32 %v6628_v5, %v4575_v61  ;;  %v6814_v61 = vld [vmem:[%s6663_s27 + $0x30] sm:$0xff]   ;;  %v4645_v17 = vld [vmem:[%s6663_s27 + $0xa8] sm:$0xff]  }
 0x1d4   : > { %v2173_v16 = vpop.f32.mrf.mxu1  ;;  %v4611_v33 = vunpack.c.l.bf16 %v6784_v19  ;;  %v2322_v47 = vadd.f32 %v2306_v38, %v2257_v2  ;;  %v4580_v26 = vunpack.c.h.bf16 %v4636_v0  ;;  %v2385_v4 = vadd.f32 %v2369_v46, %v2320_v60  ;;  %v4646_v38 = vld [vmem:[%s6663_s27 + $0xb0] sm:$0xff]  }
 0x1d5   : > { %v2370_v13 = vmul.f32 %v4603_v54, %v2173_v16  ;;  %4925 = vmatmul.mubr.msk.f32.vlgmr.msra.gmra.mxu0 %vm2719_vm8, %v2383_v10  ;;  %v2258_v54 = vmul.f32 %v6582_v31, %v4543_v57  ;;  %v4608_v40 = vunpack.c.h.bf16 %v4643_v22  ;;  %v4551_v31 = vunpack.c.l.bf16 %v6799_v63  ;;  %v2108_v14 = vpop.f32.mrf.mxu0  ;;  %v4638_v22 = vld [vmem:[%s6663_s27 + $0x70] sm:$0xff]  }
 0x1d6   : > { %v6773_v1 = vpop.f32.mrf.mxu1  ;;  %4927 = vmatprep.mubr.msk.f32.mxu0 %vm2719_vm8, %v2384_v36  ;;  %4971 = vmatpush3.bf16.msra.mxu0 %v3272_v11  ;;  %v2260_v5 = vmul.f32 %v4547_v21, %v6644_v32  ;;  %v2309_v57 = vmul.f32 %v4579_v35, %v6731_v42  ;;  %v2372_v12 = vmul.f32 %v6751_v23, %v4607_v20  ;;  %v4612_v32 = vunpack.c.h.bf16 %v6784_v19 }
 0x1d7   : > { %v2386_v29 = vadd.f32 %v2370_v13, %v2321_v53  ;;  %5037 = vmatprep.subr.msk.bf16.mxu0 %vm1294_vm0, %v6795_v48  ;;  %v2259_v0 = vmul.f32 %v6606_v3, %v4544_v34  ;;  %v2308_v46 = vmul.f32 %v6668_v41, %v4576_v49  ;;  %v2323_v21 = vadd.f32 %v2307_v59, %v2258_v54  ;;  %v4865_v19 = vpop.f32.mrf.mxu0 }
 0x1d8   : > { %v2176_v27 = vpop.f32.mrf.mxu1  ;;  %v4583_v42 = vunpack.c.l.bf16 %v4637_v43  ;;  %v4552_v13 = vunpack.c.h.bf16 %v6799_v63  ;;  %v2261_v3 = vmul.f32 %v4548_v51, %v6656_v15  ;;  %v2310_v41 = vmul.f32 %v4580_v26, %v6770_v45 }
 0x1d9   : > { %v2371_v16 = vmul.f32 %v4604_v7, %v2176_v27  ;;  %4928 = vmatmul.mubr.msk.f32.gmra.mxu0 %vm2719_vm8, %v2385_v4  ;;  %v4555_v34 = vunpack.c.l.bf16 %v6814_v61  ;;  %v2373_v2 = vmul.f32 %v6773_v1, %v4608_v40  ;;  %v2325_v11 = vadd.f32 %v2309_v57, %v2260_v5  ;;  %v2111_v40 = vpop.f32.mrf.mxu0 }
 0x1da   : > { %v6790_v56 = vpop.f32.mrf.mxu1  ;;  %4930 = vmatprep.mubr.msk.f32.mxu0 %vm2719_vm8, %v2386_v29  ;;  %v4587_v53 = vunpack.c.l.bf16 %v4638_v22  ;;  %v2388_v35 = vadd.f32 %v2372_v12, %v2323_v21  ;;  %v4615_v36 = vunpack.c.l.bf16 %v4645_v17  ;;  %v2324_v60 = vadd.f32 %v2308_v46, %v2259_v0  ;;  %v4631_v29 = vld [vmem:[%s6663_s27 + $0x38] sm:$0xff]  }
 0x1db   : > { %v2387_v7 = vadd.f32 %v2371_v16, %v2322_v47  ;;  %v4584_v49 = vunpack.c.h.bf16 %v4637_v43  ;;  %v4556_v63 = vunpack.c.h.bf16 %v6814_v61  ;;  %v2262_v45 = vmul.f32 %v6632_v28, %v4551_v31  ;;  %v4647_v61 = vld [vmem:[%s6663_s27 + $0xb8] sm:$0xff]  }
 0x1dc   : > { %v2189_v25 = vpop.f32.mrf.mxu1  ;;  %v2311_v1 = vmul.f32 %v6713_v30, %v4583_v42  ;;  %v4619_v54 = vunpack.c.l.bf16 %v4646_v38  ;;  %v2326_v59 = vadd.f32 %v2310_v41, %v2261_v3  ;;  %v2389_v47 = vadd.f32 %v2373_v2, %v2324_v60 }
 0x1dd   : > { %v2374_v23 = vmul.f32 %v4611_v33, %v2189_v25  ;;  %4931 = vmatmul.mubr.msk.f32.gmra.mxu0 %vm2719_vm8, %v2387_v7  ;;  %v4639_v25 = vld [vmem:[%s6663_s27 + $0x78] sm:$0xff]   ;;  %v4588_v33 = vunpack.c.h.bf16 %v4638_v22  ;;  %v4616_v43 = vunpack.c.h.bf16 %v4645_v17  ;;  %v2264_v26 = vmul.f32 %v4555_v34, %v6682_v37 }
 0x1de   : > { %v4879_v10 = vpop.f32.mrf.mxu1  ;;  %4933 = vmatprep.mubr.msk.f32.mxu0 %vm2719_vm8, %v2388_v35  ;;  %v2313_v4 = vmul.f32 %v4587_v53, %v2108_v14  ;;  %v2376_v28 = vmul.f32 %v6790_v56, %v4615_v36  ;;  %v2263_v30 = vmul.f32 %v6650_v52, %v4552_v13  ;;  %v2312_v5 = vmul.f32 %v6749_v8, %v4584_v49 }
 0x1df   : > { %v2390_v51 = vadd.f32 %v2374_v23, %v2325_v11  ;;  %v4620_v12 = vunpack.c.h.bf16 %v4646_v38  ;;  %v2327_v0 = vadd.f32 %v2311_v1, %v2262_v45  ;;  %v4559_v46 = vunpack.c.l.bf16 %v4631_v29 }
 0x1e0   : > { %v2192_v27 = vpop.f32.mrf.mxu1  ;;  %v4591_v22 = vunpack.c.l.bf16 %v4639_v25  ;;  %v2265_v7 = vmul.f32 %v4556_v63, %v6706_v6  ;;  %v2314_v56 = vmul.f32 %v4588_v33, %v2111_v40  ;;  %v2377_v17 = vmul.f32 %v4879_v10, %v4616_v43  ;;  %v7508_v63 = vld [vmem:[#allocation31_spill] sm:$0xff]  ;;  %v7530_v40 = vld [vmem:[#allocation29_spill] sm:$0xff] }
 0x1e1   : > { %v2375_v15 = vmul.f32 %v4612_v32, %v2192_v27  ;;  %4934 = vmatmul.mubr.msk.f32.gmra.mxu0 %vm2719_vm8, %v2389_v47  ;;  %v2329_v32 = vadd.f32 %v2313_v4, %v2264_v26  ;;  %v2392_v52 = vadd.f32 %v2376_v28, %v2327_v0  ;;  %v4623_v21 = vunpack.c.l.bf16 %v4647_v61  ;;  %v7526_v47 = vld [vmem:[#allocation25_spill] sm:$0xff]  ;;  %v7527_v43 = vld [vmem:[#allocation23_spill] sm:$0xff]  ;;  %v7529_v4 = vld [vmem:[#allocation32_spill] sm:$0xff] }
 0x1e2   : > { %v4882_v20 = vpop.f32.mrf.mxu1  ;;  %4936 = vmatprep.mubr.msk.f32.mxu0 %vm2719_vm8, %v2390_v51  ;;  %v2328_v8 = vadd.f32 %v2312_v5, %v2263_v30  ;;  %v4560_v42 = vunpack.c.h.bf16 %v4631_v29  ;;  %v4592_v13 = vunpack.c.h.bf16 %v4639_v25  ;;  %v2266_v27 = vmul.f32 %v6673_v24, %v4559_v46  ;;  %v7517_v51 = vld [vmem:[#allocation48_spill] sm:$0xff]  ;;  %v7523_v29 = vld [vmem:[#allocation26_spill] sm:$0xff]  ;;  %v7533_v30 = vld [vmem:[#allocation27_spill] sm:$0xff] }
 0x1e3   : > { %v2391_v57 = vadd.f32 %v2375_v15, %v2326_v59  ;;  %v2315_v3 = vmul.f32 %v6788_v18, %v4591_v22  ;;  %v2330_v34 = vadd.f32 %v2314_v56, %v2265_v7  ;;  %v4624_v2 = vunpack.c.h.bf16 %v4647_v61  ;;  %v7509_v15 = vld [vmem:[#allocation28_spill] sm:$0xff]  ;;  %v7536_v61 = vld [vmem:[#allocation35_spill] sm:$0xff]  ;;  %v7538_v0 = vld [vmem:[#allocation37_spill] sm:$0xff] }
 0x1e4   : > { %v2205_v16 = vpop.f32.mrf.mxu1  ;;  %v2393_v6 = vadd.f32 %v2377_v17, %v2328_v8  ;;  %v2380_v10 = vmul.f32 %v4882_v20, %v4623_v21  ;;  %v2267_v38 = vmul.f32 %v6697_v55, %v4560_v42  ;;  %v2316_v11 = vmul.f32 %v4865_v19, %v4592_v13  ;;  %v7524_v25 = vld [vmem:[#allocation24_spill] sm:$0xff]  ;;  %v7539_v46 = vld [vmem:[#allocation33_spill] sm:$0xff]  ;;  %v5292_v42 = vld [vmem:[%s7398_s9] sm:$0xff]  }
 0x1e5   : > { %v2378_v37 = vmul.f32 %v4619_v54, %v2205_v16  ;;  %4937 = vmatmul.mubr.msk.f32.gmra.mxu0 %vm2719_vm8, %v2391_v57  ;;  %v2331_v35 = vadd.f32 %v2315_v3, %v2266_v27  ;;  %v7505_v55 = vpack.c.bf16 %v6338_v58, %v6316_v44  ;;  %v3530_v19 = vsel %vm1294_vm0, %v6795_v48, 0  ;;  %v7511_v44 = vld [vmem:[#allocation40_spill] sm:$0xff]  ;;  %v7514_v48 = vld [vmem:[#allocation38_spill] sm:$0xff]  ;;  %v7535_v57 = vld [vmem:[#allocation39_spill] sm:$0xff] }
 0x1e6   : > { %v4883_v31 = vpop.f32.mrf.mxu1  ;;  %4939 = vmatprep.mubr.msk.f32.mxu0 %vm2719_vm8, %v2392_v52  ;;  %v2332_v60 = vadd.f32 %v2316_v11, %v2267_v38  ;;  %v7506_v20 = vpack.c.bf16 %v6326_v50, %v6306_v39  ;;  %v7507_v49 = vpack.c.bf16 %v6391_v62, %v6360_v9  ;;  %v7510_v45 = vpack.c.bf16 %v7508_v63, %v7509_v15  ;;  %v7512_v58 = vld [vmem:[#allocation36_spill] sm:$0xff]  ;;  %v7515_v39 = vld [vmem:[#allocation34_spill] sm:$0xff]  ;;  %v7544_v56 = vld [vmem:[#allocation45_spill] sm:$0xff] }
 0x1e7   : > { %v2394_v41 = vadd.f32 %v2378_v37, %v2329_v32  ;;  %v2381_v36 = vmul.f32 %v4883_v31, %v4624_v2  ;;  %v2396_v24 = vadd.f32 %v2380_v10, %v2331_v35  ;;  %v7513_v1 = vpack.c.bf16 %v7511_v44, %v7512_v58  ;;  %v7518_v9 = vld [vmem:[#allocation44_spill] sm:$0xff]  ;;  %v7520_v16 = vld [vmem:[#allocation46_spill] sm:$0xff]  ;;  %v7541_v37 = vld [vmem:[#allocation47_spill] sm:$0xff] }
 0x1e8   : > { %v2208_v14 = vpop.f32.mrf.mxu1  ;;  %v7516_v50 = vpack.c.bf16 %v7514_v48, %v7515_v39  ;;  %v7519_v62 = vpack.c.bf16 %v7517_v51, %v7518_v9  ;;  %v7521_v54 = vld [vmem:[#allocation42_spill] sm:$0xff]  ;;  %v7525_v33 = vpack.c.bf16 %v7523_v29, %v7524_v25  ;;  %v7528_v26 = vpack.c.bf16 %v7526_v47, %v7527_v43  ;;  %v7545_v17 = vld [vmem:[#allocation41_spill] sm:$0xff]  ;;  %v5291_v8 = vld [vmem:[%s7398_s9 + $0x8] sm:$0xff]  }
 0x1e9   : > { %v2379_v23 = vmul.f32 %v4620_v12, %v2208_v14  ;;  %4940 = vmatmul.mubr.msk.f32.gmra.mxu0 %vm2719_vm8, %v2393_v6  ;;  %v2397_v18 = vadd.f32 %v2381_v36, %v2332_v60  ;;  %v7522_v59 = vpack.c.bf16 %v7520_v16, %v7521_v54  ;;  %v7531_v28 = vpack.c.bf16 %v7529_v4, %v7530_v40  ;;  %v7532_v31 = vld [vmem:[#allocation30_spill] sm:$0xff]  ;;  %v7542_v14 = vld [vmem:[#allocation43_spill] sm:$0xff]  ;;  %v5290_v52 = vld [vmem:[%s7398_s9 + $0x10] ss:$0 sps:$4 sm:$0xff]  }
 0x1ea   : > { %4942 = vmatprep.mubr.msk.f32.mxu0 %vm2719_vm8, %v2394_v41  ;;  %v7534_v5 = vpack.c.bf16 %v7532_v31, %v7533_v30  ;;  %v7537_v12 = vpack.c.bf16 %v7535_v57, %v7536_v61  ;;  %v7540_v22 = vpack.c.bf16 %v7538_v0, %v7539_v46  ;;  %v7543_v7 = vpack.c.bf16 %v7541_v37, %v7542_v14  ;;  %v6935_v13 = vld [vmem:[%s7400_s11] sm:$0xf] }
 0x1eb   : > { %v2395_v53 = vadd.f32 %v2379_v23, %v2330_v34  ;;  %v7546_v32 = vpack.c.bf16 %v7544_v56, %v7545_v17  ;;  %5034 = vmatprep.subr.msk.bf16.mxu1 %vm1294_vm0, %v5290_v52  ;;  %v3129_v21 = vsel %vm1294_vm0, %v5290_v52, 0  ;;  %v4906_v23 = vpop.f32.mrf.mxu1  ;;  %v6956_v51 = vld [vmem:[%s7397_s8] ss:$0 sm:$0xff] }
 0x1ec   : > { %4949 = vmatpush3.bf16.msra.mxu1 %v3129_v21 }
 0x1ed   : > { %4943 = vmatmul.mubr.msk.f32.gmra.mxu0 %vm2719_vm8, %v2395_v53  ;;  %4950 = vmatprep.subr.bf16.mxu1 %v5291_v8  ;;  %v2654_v3 = vpop.f32.mrf.mxu1 }
 0x1ee   : > { %4945 = vmatprep.mubr.msk.f32.mxu0 %vm2719_vm8, %v2396_v24 }
 0x1ef   : > { %v4907_v6 = vpop.f32.mrf.mxu1 }
 0x1f0   : > { %4951 = vmatpush3.bf16.msra.mxu1 %v5291_v8 }
 0x1f1   : > { %4946 = vmatmul.mubr.msk.f32.gmra.mxu0 %vm2719_vm8, %v2397_v18  ;;  %4952 = vmatprep.subr.bf16.mxu1 %v5292_v42  ;;  %v2657_v10 = vpop.f32.mrf.mxu1 }
 0x1f2   : > { %4972 = vmatprep.mubr.msk.bf16.mxu0 %vm1269_vm1, %v7505_v55 }
 0x1f3   : > { %v4910_v11 = vpop.f32.mrf.mxu1 }
 0x1f4   : > { %4953 = vmatpush3.bf16.msra.mxu1 %v5292_v42 }
 0x1f5   : > { %4973 = vmatmul.mubr.msk.bf16.vlgmr.msra.gmra.mxu0 %vm1269_vm1, %v7506_v20  ;;  %5036 = vmatprep.subr.msk.bf16.mxu1 %vm1294_vm0, %v6935_v13  ;;  %v2670_v36 = vpop.f32.mrf.mxu1 }
 0x1f6   : > { %4976 = vmatprep.mubr.msk.bf16.mxu0 %vm1269_vm1, %v7507_v49  ;;  %5007 = vmatpush3.bf16.msra.mxu0 %v3530_v19 }
 0x1f7   : > { %v4911_v60 = vpop.f32.mrf.mxu1 }
 0x1f9   : > { %v2673_v19 = vpop.f32.mrf.mxu1 }
 0x1fb   : > { %v6943_v63 = vpop.f32.mrf.mxu1 }
 0x1fd   : > { %4977 = vmatmul.mubr.msk.bf16.gmra.mxu0 %vm1269_vm1, %v7510_v45  ;;  %v2686_v44 = vpop.f32.mrf.mxu1 }
 0x1fe   : > { %4980 = vmatprep.mubr.msk.bf16.mxu0 %vm1269_vm1, %v7513_v1 }
 0x1ff   : > { %v4915_v39 = vpop.f32.mrf.mxu1 }
 0x205   : > { %4981 = vmatmul.mubr.msk.bf16.gmra.mxu0 %vm1269_vm1, %v7516_v50 }
 0x206   : > { %4984 = vmatprep.mubr.msk.bf16.mxu0 %vm1269_vm1, %v7519_v62 }
 0x20d   : > { %4985 = vmatmul.mubr.msk.bf16.gmra.mxu0 %vm1269_vm1, %v7522_v59  ;;  %v2689_v59 = vpop.f32.mrf.mxu1 }
 0x20e   : > { %5008 = vmatprep.mubr.msk.bf16.mxu0 %vm1269_vm1, %v7525_v33 }
 0x20f   : > { %v6965_v31 = vpop.f32.mrf.mxu1 }
 0x215   : > { %5009 = vmatmul.mubr.msk.bf16.vlgmr.msra.gmra.mxu0 %vm1269_vm1, %v7528_v26 }
 0x216   : > { %5012 = vmatprep.mubr.msk.bf16.mxu0 %vm1269_vm1, %v7531_v28 }
 0x21d   : > { %5013 = vmatmul.mubr.msk.bf16.gmra.mxu0 %vm1269_vm1, %v7534_v5 }
 0x21e   : > { %5016 = vmatprep.mubr.msk.bf16.mxu0 %vm1269_vm1, %v7537_v12 }
 0x225   : > { %5017 = vmatmul.mubr.msk.bf16.gmra.mxu0 %vm1269_vm1, %v7540_v22 }
 0x226   : > { %5020 = vmatprep.mubr.msk.bf16.mxu0 %vm1269_vm1, %v7543_v7  ;;  %v2702_v7 = vpop.f32.mrf.mxu1 }
 0x22d   : > { %5021 = vmatmul.mubr.msk.bf16.gmra.mxu0 %vm1269_vm1, %v7546_v32 }
 0x272   : > { %v4888_v27 = vpop.f32.mrf.mxu0 }
 0x273   : > { %v2663_v47 = vadd.f32 %v4906_v23, %v4888_v27 }
 0x274   : > { %v2486_v41 = vpop.f32.mrf.mxu0 }
 0x275   : > { %v2655_v9 = vadd.f32 %v2654_v3, %v2486_v41  ;;  %v4919_v41 = vpop.f32.mrf.mxu1 }
 0x276   : > { %v4889_v34 = vpop.f32.mrf.mxu0 }
 0x277   : > { %v2666_v54 = vadd.f32 %v4907_v6, %v4889_v34 }
 0x278   : > { %v2489_v2 = vpop.f32.mrf.mxu0 }
 0x279   : > { %v2658_v48 = vadd.f32 %v2657_v10, %v2489_v2 }
 0x27a   : > { %v4892_v38 = vpop.f32.mrf.mxu0 }
 0x27b   : > { %v2679_v52 = vadd.f32 %v4910_v11, %v4892_v38 }
 0x27c   : > { %v2502_v53 = vpop.f32.mrf.mxu0 }
 0x27d   : > { %v2671_v61 = vadd.f32 %v2670_v36, %v2502_v53 }
 0x27e   : > { %v4893_v35 = vpop.f32.mrf.mxu0 }
 0x27f   : > { %v2682_v37 = vadd.f32 %v4911_v60, %v4893_v35 }
 0x280   : > { %v2505_v24 = vpop.f32.mrf.mxu0 }
 0x281   : > { %v2674_v40 = vadd.f32 %v2673_v19, %v2505_v24  ;;  %v2705_v24 = vpop.f32.mrf.mxu1 }
 0x282   : > { %v6939_v18 = vpop.f32.mrf.mxu0 }
 0x284   : > { %v2518_v55 = vpop.f32.mrf.mxu0 }
 0x285   : > { %v2687_v10 = vadd.f32 %v2686_v44, %v2518_v55  ;;  %v2695_v55 = vadd.f32 %v6943_v63, %v6939_v18 }
 0x286   : > { %v6941_v20 = vpop.f32.mrf.mxu0 }
 0x287   : > { %v2698_v44 = vadd.f32 %v4915_v39, %v6941_v20 }
 0x288   : > { %v2521_v49 = vpop.f32.mrf.mxu0 }
 0x289   : > { %v2690_v27 = vadd.f32 %v2689_v59, %v2521_v49 }
 0x28a   : > { %v6945_v15 = vpop.f32.mrf.mxu0 }
 0x28c   : > { %v6947_v45 = vpop.f32.mrf.mxu0 }
 0x28e   : > { %v6949_v58 = vpop.f32.mrf.mxu0 }
 0x290   : > { %v6951_v1 = vpop.f32.mrf.mxu0 }
 0x291   : > { %v2706_v59 = vadd.f32 %v2705_v24, %v6951_v1 }
 0x295   : > { %v4926_v50 = vpop.f32.mrf.mxu0 }
 0x296   : > { %v2918_v62 = vadd.f32 %v4926_v50, %v2658_v48 }
 0x297   : > { %v2838_v16 = vpop.f32.mrf.mxu0 }
 0x298   : > { %v6959_v29 = vadd.f32 %v6956_v51, %v2918_v62  ;;  %v2917_v25 = vadd.f32 %v2838_v16, %v2655_v9 }
 0x299   : > { %v4929_v33 = vpop.f32.mrf.mxu0 }
 0x29a   : > { %v4434_v43 = vmul.f32 -1.442695, %v6959_v29  ;;  %v6963_v26 = vadd.f32 %v6956_v51, %v2917_v25  ;;  %v2920_v4 = vadd.f32 %v4929_v33, %v2666_v54 }
 0x29b   : > { %v2848_v28 = vpop.f32.mrf.mxu0 }
 0x29c   : > { %5325 = vpow2.f32 %v4434_v43  ;;  %v4433_v30 = vmul.f32 -1.442695, %v6963_v26  ;;  %v6969_v5 = vadd.f32 %v6956_v51, %v2920_v4  ;;  %v2919_v57 = vadd.f32 %v2848_v28, %v2663_v47 }
 0x29d   : > { %v4932_v12 = vpop.f32.mrf.mxu0 }
 0x29e   : > { %5327 = vpow2.f32 %v4433_v30  ;;  %v4436_v0 = vmul.f32 -1.442695, %v6969_v5  ;;  %v6973_v46 = vadd.f32 %v6956_v51, %v2919_v57  ;;  %v2922_v22 = vadd.f32 %v4932_v12, %v2674_v40 }
 0x29f   : > { %v2858_v14 = vpop.f32.mrf.mxu0  ;;  %v2703_v30 = vadd.f32 %v2702_v7, %v6947_v45  ;;  %v2714_v57 = vadd.f32 %v4919_v41, %v6949_v58 }
 0x2a0   : > { %5329 = vpow2.f32 %v4436_v0  ;;  %v4435_v56 = vmul.f32 -1.442695, %v6973_v46  ;;  %v6977_v17 = vadd.f32 %v6956_v51, %v2922_v22  ;;  %v2921_v32 = vadd.f32 %v2858_v14, %v2671_v61 }
 0x2a1   : > { %v4935_v21 = vpop.f32.mrf.mxu0 }
 0x2a2   : > { %5331 = vpow2.f32 %v4435_v56  ;;  %v4438_v8 = vmul.f32 -1.442695, %v6977_v17  ;;  %v6981_v42 = vadd.f32 %v6956_v51, %v2921_v32  ;;  %v2924_v23 = vadd.f32 %v4935_v21, %v2682_v37 }
 0x2a3   : > { %v2868_v3 = vpop.f32.mrf.mxu0  ;;  %v2711_v56 = vadd.f32 %v6965_v31, %v6945_v15 }
 0x2a4   : > { %5333 = vpow2.f32 %v4438_v8  ;;  %v4437_v34 = vmul.f32 -1.442695, %v6981_v42  ;;  %v6985_v6 = vadd.f32 %v6956_v51, %v2924_v23  ;;  %v2923_v2 = vadd.f32 %v2868_v3, %v2679_v52 }
 0x2a5   : > { %v4938_v38 = vpop.f32.mrf.mxu0 }
 0x2a6   : > { %5335 = vpow2.f32 %v4437_v34  ;;  %v4440_v11 = vmul.f32 -1.442695, %v6985_v6  ;;  %v6989_v53 = vadd.f32 %v6956_v51, %v2923_v2  ;;  %v2926_v35 = vadd.f32 %v4938_v38, %v2690_v27 }
 0x2a7   : > { %v2878_v36 = vpop.f32.mrf.mxu0 }
 0x2a8   : > { %5337 = vpow2.f32 %v4440_v11  ;;  %v4439_v60 = vmul.f32 -1.442695, %v6989_v53  ;;  %v6993_v19 = vadd.f32 %v6956_v51, %v2926_v35  ;;  %v2925_v49 = vadd.f32 %v2878_v36, %v2687_v10 }
 0x2a9   : > { %v5326_v48 = vpop.eup %5325  ;;  %v4941_v50 = vpop.f32.mrf.mxu0 }
 0x2aa   : > { %v3005_v9 = vadd.f32 1.0, %v5326_v48  ;;  %5339 = vpow2.f32 %v4439_v60  ;;  %v4442_v62 = vmul.f32 -1.442695, %v6993_v19  ;;  %v7000_v16 = vadd.f32 %v6956_v51, %v2925_v49 }
 0x2ab   : > { %v5328_v54 = vpop.eup %5327  ;;  %v2928_v25 = vadd.f32 %v4941_v50, %v2698_v44  ;;  %v2888_v33 = vpop.f32.mrf.mxu0 }
 0x2ac   : > { %5341 = vrcp.f32 %v3005_v9  ;;  %v3004_v47 = vadd.f32 1.0, %v5328_v54  ;;  %v4441_v43 = vmul.f32 -1.442695, %v7000_v16  ;;  %v2927_v18 = vadd.f32 %v2888_v33, %v2695_v55 }
 0x2ad   : > { %v5330_v63 = vpop.eup %5329  ;;  %5343 = vpow2.f32 %v4442_v62  ;;  %v7005_v20 = vadd.f32 %v6956_v51, %v2928_v25  ;;  %v4944_v39 = vpop.f32.mrf.mxu0 }
 0x2ae   : > { %5345 = vrcp.f32 %v3004_v47  ;;  %v3007_v4 = vadd.f32 1.0, %v5330_v63  ;;  %v7008_v40 = vadd.f32 %v6956_v51, %v2927_v18  ;;  %v2930_v28 = vadd.f32 %v4944_v39, %v2706_v59 }
 0x2af   : > { %v5332_v1 = vpop.eup %5331  ;;  %5347 = vpow2.f32 %v4441_v43  ;;  %v4444_v61 = vmul.f32 -1.442695, %v7005_v20  ;;  %v2898_v12 = vpop.f32.mrf.mxu0  ;;  %v3396_v63 = vsel %vm1294_vm0, %v6935_v13, 0 }
 0x2b0   : > { %5349 = vrcp.f32 %v3007_v4  ;;  %v3006_v0 = vadd.f32 1.0, %v5332_v1  ;;  %v4443_v22 = vmul.f32 -1.442695, %v7008_v40  ;;  %v7015_v37 = vadd.f32 %v6956_v51, %v2930_v28 }
 0x2b1   : > { %v5334_v14 = vpop.eup %5333  ;;  %5351 = vpow2.f32 %v4444_v61  ;;  %v2929_v32 = vadd.f32 %v2898_v12, %v2703_v30  ;;  %v4947_v45 = vpop.f32.mrf.mxu0 }
 0x2b2   : > { %5353 = vrcp.f32 %v3006_v0  ;;  %v3009_v58 = vadd.f32 1.0, %v5334_v14  ;;  %v4446_v7 = vmul.f32 -1.442695, %v7015_v37  ;;  %v2932_v52 = vadd.f32 %v4947_v45, %v2714_v57 }
 0x2b3   : > { %v5336_v21 = vpop.eup %5335  ;;  %5355 = vpow2.f32 %v4443_v22  ;;  %v7021_v8 = vadd.f32 %v6956_v51, %v2929_v32  ;;  %v2908_v23 = vpop.f32.mrf.mxu0 }
 0x2b4   : > { %5357 = vrcp.f32 %v3009_v58  ;;  %v3008_v27 = vadd.f32 1.0, %v5336_v21  ;;  %v7024_v3 = vadd.f32 %v6956_v51, %v2932_v52  ;;  %v2931_v15 = vadd.f32 %v2908_v23, %v2711_v56 }
 0x2b5   : > { %v5338_v31 = vpop.eup %5337  ;;  %5359 = vpow2.f32 %v4446_v7  ;;  %v4445_v41 = vmul.f32 -1.442695, %v7021_v8 }
 0x2b6   : > { %5361 = vrcp.f32 %v3008_v27  ;;  %v3011_v34 = vadd.f32 1.0, %v5338_v31  ;;  %v4448_v2 = vmul.f32 -1.442695, %v7024_v3  ;;  %v7029_v10 = vadd.f32 %v6956_v51, %v2931_v15 }
 0x2b7   : > { %v5340_v38 = vpop.eup %5339  ;;  %5363 = vpow2.f32 %v4445_v41 }
 0x2b8   : > { %5365 = vrcp.f32 %v3011_v34  ;;  %v3010_v11 = vadd.f32 1.0, %v5340_v38  ;;  %v4447_v35 = vmul.f32 -1.442695, %v7029_v10 }
 0x2b9   : > { %v5342_v36 = vpop.eup %5341  ;;  %5367 = vpow2.f32 %v4448_v2  ;;  %v7548_v2 = vld [vmem:[#allocation9_spill] sm:$0xff] }
 0x2ba   : > { %v5344_v24 = vpop.eup %5343  ;;  %5369 = vrcp.f32 %v3010_v11  ;;  %v7033_v55 = vmul.f32 %v5342_v36, %v6959_v29  ;;  %v7550_v11 = vld [vmem:[#allocation11_spill] sm:$0xff] }
 0x2bb   : > { %v5346_v60 = vpop.eup %5345  ;;  %v3013_v49 = vadd.f32 1.0, %v5344_v24  ;;  %5371 = vpow2.f32 %v4447_v35  ;;  %v7551_v35 = vld [vmem:[#allocation7_spill] sm:$0xff] }
 0x2bc   : > { %v5348_v48 = vpop.eup %5347  ;;  %v7036_v51 = vmul.f32 %v5346_v60, %v6963_v26  ;;  %v7552_v36 = vpack.c.bf16 %v7550_v11, %v7551_v35  ;;  %v7556_v60 = vld [vmem:[#allocation19_spill] sm:$0xff] }
 0x2bd   : > { %v5350_v44 = vpop.eup %5349  ;;  %5373 = vrcp.f32 %v3013_v49  ;;  %v3012_v50 = vadd.f32 1.0, %v5348_v48  ;;  %v7557_v49 = vld [vmem:[#allocation15_spill] sm:$0xff] }
 0x2be   : > { %v5352_v9 = vpop.eup %5351  ;;  %v3068_v62 = vpack.c.bf16 %v7033_v55, %v7036_v51  ;;  %v7041_v33 = vmul.f32 %v5350_v44, %v6969_v5  ;;  %v7558_v48 = vpack.c.bf16 %v7556_v60, %v7557_v49  ;;  %v7559_v44 = vld [vmem:[#allocation14_spill] sm:$0xff] }
 0x2bf   : > { %v5354_v54 = vpop.eup %5353  ;;  %5375 = vrcp.f32 %v3012_v50  ;;  %v3015_v59 = vadd.f32 1.0, %v5352_v9  ;;  %v7560_v50 = vld [vmem:[#allocation10_spill] sm:$0xff] }
 0x2c0   : > { %v5356_v25 = vpop.eup %5355  ;;  %v7044_v29 = vmul.f32 %v5354_v54, %v6973_v46  ;;  %4954 = vmatprep.mubr.msk.bf16.mxu1 %vm3103_vm9, %v3068_v62  ;;  %v7561_v9 = vpack.c.bf16 %v7559_v44, %v7560_v50  ;;  %v7562_v62 = vld [vmem:[#allocation12_spill] sm:$0xff] }
 0x2c1   : > { %v5358_v26 = vpop.eup %5357  ;;  %5377 = vrcp.f32 %v3015_v59  ;;  %v3014_v47 = vadd.f32 1.0, %v5356_v25  ;;  %v7563_v54 = vld [vmem:[#allocation8_spill] sm:$0xff]  ;;  %v7565_v25 = vld [vmem:[#allocation22_spill] sm:$0xff] }
 0x2c2   : > { %v5360_v43 = vpop.eup %5359  ;;  %v3069_v18 = vpack.c.bf16 %v7041_v33, %v7044_v29  ;;  %v7052_v28 = vmul.f32 %v5358_v26, %v6977_v17  ;;  %v7564_v59 = vpack.c.bf16 %v7562_v62, %v7563_v54  ;;  %v7566_v26 = vld [vmem:[#allocation18_spill] sm:$0xff] }
 0x2c3   : > { %v5362_v39 = vpop.eup %5361  ;;  %5379 = vrcp.f32 %v3014_v47  ;;  %v3017_v4 = vadd.f32 1.0, %v5360_v43  ;;  %v7567_v47 = vpack.c.bf16 %v7565_v25, %v7566_v26  ;;  %v7568_v43 = vld [vmem:[#allocation20_spill] sm:$0xff] }
 0x2c4   : > { %v5364_v5 = vpop.eup %5363  ;;  %v7055_v46 = vmul.f32 %v5362_v39, %v6981_v42  ;;  %4955 = vmatmul.mubr.msk.bf16.vlgmr.msra.gmra.mxu1 %vm3103_vm9, %v3069_v18  ;;  %v7569_v18 = vld [vmem:[#allocation16_spill] sm:$0xff]  ;;  %v7138_v39 = vpop.f32.mrf.mxu0 }
 0x2c5   : > { %v5366_v1 = vpop.eup %5365  ;;  %5381 = vrcp.f32 %v3017_v4  ;;  %v3016_v30 = vadd.f32 1.0, %v5364_v5  ;;  %4989 = vmatpush3.bf16.msra.mxu1 %v3396_v63  ;;  %v7570_v63 = vpack.c.bf16 %v7568_v43, %v7569_v18 }
 0x2c6   : > { %v5368_v57 = vpop.eup %5367  ;;  %v3070_v13 = vpack.c.bf16 %v7052_v28, %v7055_v46  ;;  %v7061_v17 = vmul.f32 %v5366_v1, %v6985_v6  ;;  %v7140_v4 = vpop.f32.mrf.mxu0 }
 0x2c7   : > { %v5370_v61 = vpop.eup %5369  ;;  %5383 = vrcp.f32 %v3016_v30  ;;  %v3019_v12 = vadd.f32 1.0, %v5368_v57 }
 0x2c8   : > { %v5372_v0 = vpop.eup %5371  ;;  %v7064_v42 = vmul.f32 %v5370_v61, %v6989_v53  ;;  %4958 = vmatprep.mubr.msk.bf16.mxu1 %vm3103_vm9, %v3070_v13  ;;  %v7142_v5 = vpop.f32.mrf.mxu0 }
 0x2c9   : > { %5385 = vrcp.f32 %v3019_v12  ;;  %v3018_v22 = vadd.f32 1.0, %v5372_v0 }
 0x2ca   : > { %v5374_v14 = vpop.eup %5373  ;;  %v3071_v56 = vpack.c.bf16 %v7061_v17, %v7064_v42  ;;  %v7144_v1 = vpop.f32.mrf.mxu0 }
 0x2cb   : > { %5387 = vrcp.f32 %v3018_v22  ;;  %v7071_v45 = vmul.f32 %v5374_v14, %v6993_v19 }
 0x2cc   : > { %v5376_v32 = vpop.eup %5375  ;;  %4959 = vmatmul.mubr.msk.bf16.gmra.mxu1 %vm3103_vm9, %v3071_v56  ;;  %v7146_v30 = vpop.f32.mrf.mxu0 }
 0x2cd   : > { %v7074_v6 = vmul.f32 %v5376_v32, %v7000_v16 }
 0x2ce   : > { %v5378_v53 = vpop.eup %5377  ;;  %v7148_v57 = vpop.f32.mrf.mxu0 }
 0x2cf   : > { %v3072_v58 = vpack.c.bf16 %v7071_v45, %v7074_v6  ;;  %v7079_v52 = vmul.f32 %v5378_v53, %v7005_v20 }
 0x2d0   : > { %v5380_v7 = vpop.eup %5379  ;;  %v7150_v13 = vpop.f32.mrf.mxu0 }
 0x2d1   : > { %v7082_v21 = vmul.f32 %v5380_v7, %v7008_v40  ;;  %4962 = vmatprep.mubr.msk.bf16.mxu1 %vm3103_vm9, %v3072_v58  ;;  %v7171_v58 = vld [vmem:[%s7399_s10] ss:$0 sm:$0xff] }
 0x2d2   : > { %v5382_v23 = vpop.eup %5381  ;;  %v7152_v61 = vpop.f32.mrf.mxu0 }
 0x2d3   : > { %v3073_v19 = vpack.c.bf16 %v7079_v52, %v7082_v21  ;;  %v7088_v16 = vmul.f32 %v5382_v23, %v7015_v37 }
 0x2d4   : > { %v5384_v27 = vpop.eup %5383  ;;  %v7154_v12 = vpop.f32.mrf.mxu0 }
 0x2d5   : > { %v7091_v15 = vmul.f32 %v5384_v27, %v7021_v8  ;;  %4963 = vmatmul.mubr.msk.bf16.gmra.mxu1 %vm3103_vm9, %v3073_v19  ;;  %v7547_v8 = vld [vmem:[#allocation13_spill] sm:$0xff] }
 0x2d6   : > { %v5386_v20 = vpop.eup %5385  ;;  %v7549_v38 = vpack.c.bf16 %v7547_v8, %v7548_v2  ;;  %v7156_v0 = vpop.f32.mrf.mxu0 }
 0x2d7   : > { %v3074_v40 = vpack.c.bf16 %v7088_v16, %v7091_v15  ;;  %v7097_v41 = vmul.f32 %v5386_v20, %v7024_v3  ;;  %v7553_v3 = vld [vmem:[#allocation21_spill] sm:$0xff] }
 0x2d8   : > { %v5388_v31 = vpop.eup %5387  ;;  %v7158_v22 = vpop.f32.mrf.mxu0 }
 0x2d9   : > { %v7100_v34 = vmul.f32 %v5388_v31, %v7029_v10  ;;  %4966 = vmatprep.mubr.msk.bf16.mxu1 %vm3103_vm9, %v3074_v40  ;;  %v7554_v10 = vld [vmem:[#allocation17_spill] sm:$0xff] }
 0x2da   : > { %v7555_v24 = vpack.c.bf16 %v7553_v3, %v7554_v10  ;;  %v7160_v14 = vpop.f32.mrf.mxu0 }
 0x2db   : > { %v3075_v37 = vpack.c.bf16 %v7097_v41, %v7100_v34 }
 0x2dc   : > { %v7162_v56 = vpop.f32.mrf.mxu0 }
 0x2dd   : > { %4967 = vmatmul.mubr.msk.bf16.gmra.mxu1 %vm3103_vm9, %v3075_v37 }
 0x2de   : > { %4990 = vmatprep.mubr.msk.bf16.mxu1 %vm1269_vm1, %v7549_v38  ;;  %v7164_v32 = vpop.f32.mrf.mxu0 }
 0x2e0   : > { %v7166_v53 = vpop.f32.mrf.mxu0 }
 0x2e2   : > { %v7173_v23 = vpop.f32.mrf.mxu0 }
 0x2e4   : > { %v7177_v37 = vpop.f32.mrf.mxu0 }
 0x2e5   : > { %4991 = vmatmul.mubr.msk.bf16.vlgmr.msra.gmra.mxu1 %vm1269_vm1, %v7552_v36 }
 0x2e6   : > { %4994 = vmatprep.mubr.msk.bf16.mxu1 %vm1269_vm1, %v7555_v24  ;;  %v7181_v3 = vpop.f32.mrf.mxu0 }
 0x2e8   : > { %v7185_v50 = vpop.f32.mrf.mxu0 }
 0x2ea   : > { %v7189_v26 = vpop.f32.mrf.mxu0 }
 0x2ed   : > { %4995 = vmatmul.mubr.msk.bf16.gmra.mxu1 %vm1269_vm1, %v7558_v48 }
 0x2ee   : > { %4998 = vmatprep.mubr.msk.bf16.mxu1 %vm1269_vm1, %v7561_v9 }
 0x2f5   : > { %4999 = vmatmul.mubr.msk.bf16.gmra.mxu1 %vm1269_vm1, %v7564_v59 }
 0x2f6   : > { %5002 = vmatprep.mubr.msk.bf16.mxu1 %vm1269_vm1, %v7567_v47 }
 0x2fd   : > { %5003 = vmatmul.mubr.msk.bf16.gmra.mxu1 %vm1269_vm1, %v7570_v63 }
 0x384   : > { %v4956_v7 = vpop.f32.mrf.mxu1 }
 0x385   : > { %v3174_v19 = vadd.f32 %v4956_v7, %v7171_v58 }
 0x386   : > { %v3165_v27 = vpop.f32.mrf.mxu1 }
 0x387   : > { %v4489_v20 = vmul.f32 -1.442695, %v3174_v19  ;;  %v3166_v40 = vadd.f32 %v7171_v58, %v3165_v27 }
 0x388   : > { %v4957_v31 = vpop.f32.mrf.mxu1 }
 0x389   : > { %5389 = vpow2.f32 %v4489_v20  ;;  %v4487_v8 = vmul.f32 -1.442695, %v3166_v40  ;;  %v3177_v2 = vadd.f32 %v4957_v31, %v7171_v58  ;;  %v7193_v31 = vpop.f32.mrf.mxu0 }
 0x38a   : > { %v3168_v38 = vpop.f32.mrf.mxu1 }
 0x38b   : > { %5391 = vpow2.f32 %v4487_v8  ;;  %v4490_v11 = vmul.f32 -1.442695, %v3177_v2  ;;  %v3169_v35 = vadd.f32 %v7171_v58, %v3168_v38 }
 0x38c   : > { %v4960_v36 = vpop.f32.mrf.mxu1 }
 0x38d   : > { %5393 = vpow2.f32 %v4490_v11  ;;  %v4488_v10 = vmul.f32 -1.442695, %v3169_v35  ;;  %v3190_v24 = vadd.f32 %v4960_v36, %v7171_v58 }
 0x38e   : > { %v3181_v60 = vpop.f32.mrf.mxu1 }
 0x38f   : > { %5395 = vpow2.f32 %v4488_v10  ;;  %v4493_v49 = vmul.f32 -1.442695, %v3190_v24  ;;  %v3182_v48 = vadd.f32 %v7171_v58, %v3181_v60 }
 0x390   : > { %v4961_v44 = vpop.f32.mrf.mxu1 }
 0x391   : > { %5397 = vpow2.f32 %v4493_v49  ;;  %v4491_v9 = vmul.f32 -1.442695, %v3182_v48  ;;  %v3193_v62 = vadd.f32 %v4961_v44, %v7171_v58  ;;  %v7197_v48 = vpop.f32.mrf.mxu0 }
 0x392   : > { %v3184_v54 = vpop.f32.mrf.mxu1 }
 0x393   : > { %5399 = vpow2.f32 %v4491_v9  ;;  %v4494_v59 = vmul.f32 -1.442695, %v3193_v62  ;;  %v3185_v25 = vadd.f32 %v7171_v58, %v3184_v54 }
 0x395   : > { %5401 = vpow2.f32 %v4494_v59  ;;  %v4492_v47 = vmul.f32 -1.442695, %v3185_v25  ;;  %v4964_v43 = vpop.f32.mrf.mxu1 }
 0x396   : > { %v5390_v18 = vpop.eup %5389  ;;  %v3206_v63 = vadd.f32 %v4964_v43, %v7171_v58 }
 0x397   : > { %v3695_v7 = vadd.f32 1.0, %v5390_v18  ;;  %5403 = vpow2.f32 %v4492_v47  ;;  %v3197_v19 = vpop.f32.mrf.mxu1 }
 0x398   : > { %v5392_v27 = vpop.eup %5391  ;;  %v4497_v20 = vmul.f32 -1.442695, %v3206_v63  ;;  %v3198_v40 = vadd.f32 %v7171_v58, %v3197_v19 }
 0x399   : > { %v3693_v8 = vadd.f32 1.0, %v5392_v27  ;;  %v4965_v2 = vpop.f32.mrf.mxu1 }
 0x39a   : > { %v5394_v38 = vpop.eup %5393  ;;  %5405 = vpow2.f32 %v4497_v20  ;;  %v4495_v11 = vmul.f32 -1.442695, %v3198_v40  ;;  %v3209_v35 = vadd.f32 %v4965_v2, %v7171_v58 }
 0x39b   : > { %5407 = vrcp.f32 %v3695_v7  ;;  %v3696_v36 = vadd.f32 1.0, %v5394_v38  ;;  %v3200_v10 = vpop.f32.mrf.mxu1  ;;  %v7201_v7 = vpop.f32.mrf.mxu0 }
 0x39c   : > { %v5396_v24 = vpop.eup %5395  ;;  %5409 = vpow2.f32 %v4495_v11  ;;  %v4498_v60 = vmul.f32 -1.442695, %v3209_v35  ;;  %v3201_v49 = vadd.f32 %v7171_v58, %v3200_v10 }
 0x39d   : > { %5411 = vrcp.f32 %v3693_v8  ;;  %v3694_v44 = vadd.f32 1.0, %v5396_v24  ;;  %v4968_v9 = vpop.f32.mrf.mxu1 }
 0x39e   : > { %v5398_v62 = vpop.eup %5397  ;;  %5413 = vpow2.f32 %v4498_v60  ;;  %v4496_v54 = vmul.f32 -1.442695, %v3201_v49  ;;  %v3222_v59 = vadd.f32 %v4968_v9, %v7171_v58 }
 0x39f   : > { %5415 = vrcp.f32 %v3696_v36  ;;  %v3699_v25 = vadd.f32 1.0, %v5398_v62  ;;  %v3213_v47 = vpop.f32.mrf.mxu1  ;;  %v7205_v36 = vpop.f32.mrf.mxu0 }
 0x3a0   : > { %v5400_v43 = vpop.eup %5399  ;;  %5417 = vpow2.f32 %v4496_v54  ;;  %v4501_v18 = vmul.f32 -1.442695, %v3222_v59  ;;  %v3214_v63 = vadd.f32 %v7171_v58, %v3213_v47 }
 0x3a1   : > { %5419 = vrcp.f32 %v3694_v44  ;;  %v3697_v19 = vadd.f32 1.0, %v5400_v43  ;;  %v4969_v27 = vpop.f32.mrf.mxu1  ;;  %v7212_v43 = vpop.f32.mrf.mxu0 }
 0x3a2   : > { %v5402_v20 = vpop.eup %5401  ;;  %5421 = vpow2.f32 %v4501_v18  ;;  %v4499_v40 = vmul.f32 -1.442695, %v3214_v63  ;;  %v3225_v8 = vadd.f32 %v4969_v27, %v7171_v58 }
 0x3a3   : > { %5423 = vrcp.f32 %v3699_v25  ;;  %v3216_v2 = vpop.f32.mrf.mxu1  ;;  %v3700_v10 = vadd.f32 1.0, %v5402_v20 }
 0x3a4   : > { %v5404_v38 = vpop.eup %5403  ;;  %5425 = vpow2.f32 %v4499_v40  ;;  %v4502_v11 = vmul.f32 -1.442695, %v3225_v8  ;;  %v3217_v35 = vadd.f32 %v7171_v58, %v3216_v2 }
 0x3a5   : > { %5427 = vrcp.f32 %v3697_v19  ;;  %v4992_v24 = vpop.f32.mrf.mxu1  ;;  %v3698_v9 = vadd.f32 1.0, %v5404_v38 }
 0x3a6   : > { %5429 = vpow2.f32 %v4502_v11  ;;  %v4500_v60 = vmul.f32 -1.442695, %v3217_v35  ;;  %v3441_v49 = vadd.f32 %v4992_v24, %v7138_v39  ;;  %v7217_v35 = vpop.f32.mrf.mxu0 }
 0x3a7   : > { %v5406_v44 = vpop.eup %5405  ;;  %v3432_v62 = vpop.f32.mrf.mxu1 }
 0x3a8   : > { %v5408_v54 = vpop.eup %5407  ;;  %v3703_v59 = vadd.f32 1.0, %v5406_v44  ;;  %5431 = vpow2.f32 %v4500_v60  ;;  %v3631_v25 = vadd.f32 %v7177_v37, %v3441_v49  ;;  %v3433_v58 = vadd.f32 %v3432_v62, %v7140_v4 }
 0x3a9   : > { %v5410_v47 = vpop.eup %5409  ;;  %5433 = vrcp.f32 %v3700_v10  ;;  %v4993_v18 = vpop.f32.mrf.mxu1 }
 0x3aa   : > { %v5412_v63 = vpop.eup %5411  ;;  %v3701_v19 = vadd.f32 1.0, %v5410_v47  ;;  %v3743_v39 = vmul.f32 %v5408_v54, %v3631_v25  ;;  %v3629_v27 = vadd.f32 %v7181_v3, %v3433_v58  ;;  %5435 = vrcp.f32 %v3698_v9  ;;  %v5019_v47 = vpop.f32.mrf.mxu0 }
 0x3ab   : > { %v5414_v20 = vpop.eup %5413  ;;  %v3444_v40 = vadd.f32 %v4993_v18, %v7142_v5  ;;  %v3435_v8 = vpop.f32.mrf.mxu1  ;;  %5437 = vrcp.f32 %v3703_v59 }
 0x3ac   : > { %v5416_v2 = vpop.eup %5415  ;;  %v3704_v37 = vadd.f32 1.0, %v5414_v20  ;;  %v3759_v4 = vadd.f32 %v3743_v39, %v7044_v29  ;;  %v3741_v38 = vmul.f32 %v5412_v63, %v3629_v27  ;;  %v3436_v24 = vadd.f32 %v3435_v8, %v7144_v1 }
 0x3ad   : > { %v5418_v11 = vpop.eup %5417  ;;  %v3632_v10 = vadd.f32 %v7185_v50, %v3444_v40  ;;  %v4996_v60 = vpop.f32.mrf.mxu1  ;;  %5439 = vrcp.f32 %v3701_v19 }
 0x3ae   : > { %v5420_v3 = vpop.eup %5419  ;;  %v3702_v49 = vadd.f32 1.0, %v5418_v11  ;;  %3775 = vst.msk [vmem:[%s7221_s21 + $0x10] sm:$0xff] %vm3103_vm9, %v3759_v4  ;;  %v3757_v29 = vadd.f32 %v3741_v38, %v7036_v51  ;;  %v3457_v5 = vadd.f32 %v4996_v60, %v7146_v30  ;;  %v3630_v50 = vadd.f32 %v7189_v26, %v3436_v24 }
 0x3af   : > { %v5422_v44 = vpop.eup %5421  ;;  %v3744_v9 = vmul.f32 %v5416_v2, %v3632_v10  ;;  %v3448_v62 = vpop.f32.mrf.mxu1  ;;  %5441 = vrcp.f32 %v3704_v37 }
 0x3b0   : > { %v5424_v1 = vpop.eup %5423  ;;  %v3707_v54 = vadd.f32 1.0, %v5422_v44  ;;  %3773 = vst.msk [vmem:[%s7221_s21] sm:$0xff] %vm3103_vm9, %v3757_v29  ;;  %v3635_v59 = vadd.f32 %v7193_v31, %v3457_v5  ;;  %v3449_v25 = vadd.f32 %v3448_v62, %v7148_v57  ;;  %v3742_v30 = vmul.f32 %v5420_v3, %v3630_v50  ;;  %v3601_v37 = vpop.f32.mrf.mxu0 }
 0x3b1   : > { %v5426_v58 = vpop.eup %5425  ;;  %v3760_v51 = vadd.f32 %v3744_v9, %v7041_v33  ;;  %v4997_v18 = vpop.f32.mrf.mxu1  ;;  %5443 = vrcp.f32 %v3702_v49 }
 0x3b2   : > { %v5428_v63 = vpop.eup %5427  ;;  %v3705_v26 = vadd.f32 1.0, %v5426_v58  ;;  %v3747_v19 = vmul.f32 %v5424_v1, %v3635_v59  ;;  %v3633_v39 = vadd.f32 %v7197_v48, %v3449_v25  ;;  %v3758_v31 = vadd.f32 %v3742_v30, %v7033_v55  ;;  %v5022_v29 = vpop.f32.mrf.mxu0 }
 0x3b3   : > { %v5430_v27 = vpop.eup %5429  ;;  %3776 = vst.msk [vmem:[%s7221_s21 + $0x18] sm:$0xff] %vm3103_vm9, %v3760_v51  ;;  %v3460_v57 = vadd.f32 %v4997_v18, %v7150_v13  ;;  %v3451_v20 = vpop.f32.mrf.mxu1  ;;  %5445 = vrcp.f32 %v3707_v54 }
 0x3b4   : > { %v3708_v33 = vadd.f32 1.0, %v5430_v27  ;;  %v3763_v40 = vadd.f32 %v3747_v19, %v7064_v42  ;;  %v3745_v8 = vmul.f32 %v5428_v63, %v3633_v39  ;;  %3774 = vst.msk [vmem:[%s7221_s21 + $0x8] sm:$0xff] %vm3103_vm9, %v3758_v31  ;;  %v3452_v4 = vadd.f32 %v3451_v20, %v7152_v61  ;;  %v3614_v25 = vpop.f32.mrf.mxu0 }
 0x3b5   : > { %v5432_v2 = vpop.eup %5431  ;;  %v3636_v48 = vadd.f32 %v7201_v7, %v3460_v57  ;;  %v5000_v38 = vpop.f32.mrf.mxu1  ;;  %5447 = vrcp.f32 %v3705_v26 }
 0x3b6   : > { %v5434_v55 = vpop.eup %5433  ;;  %v3706_v11 = vadd.f32 1.0, %v5432_v2  ;;  %3779 = vst.msk [vmem:[%s7221_s21 + $0x30] sm:$0xff] %vm3103_vm9, %v3763_v40  ;;  %v3761_v13 = vadd.f32 %v3745_v8, %v7055_v46  ;;  %v3473_v42 = vadd.f32 %v5000_v38, %v7154_v12  ;;  %v3634_v24 = vadd.f32 %v7205_v36, %v3452_v4  ;;  %v5023_v19 = vpop.f32.mrf.mxu0 }
 0x3b7   : > { %v3748_v10 = vmul.f32 %v5434_v55, %v3636_v48  ;;  %v3464_v60 = vpop.f32.mrf.mxu1  ;;  %v5436_v3 = vpop.eup %5435  ;;  %5449 = vrcp.f32 %v3708_v33 }
 0x3b8   : > { %3777 = vst.msk [vmem:[%s7221_s21 + $0x20] sm:$0xff] %vm3103_vm9, %v3761_v13  ;;  %v3639_v61 = vadd.f32 %v7212_v43, %v3473_v42  ;;  %v3465_v7 = vadd.f32 %v3464_v60, %v7156_v0  ;;  %v5438_v49 = vpop.eup %5437  ;;  %v3746_v46 = vmul.f32 %v5436_v3, %v3634_v24  ;;  %5451 = vrcp.f32 %v3706_v11  ;;  %v3617_v2 = vpop.f32.mrf.mxu0 }
 0x3b9   : > { %v3764_v5 = vadd.f32 %v3748_v10, %v7061_v17  ;;  %v5001_v12 = vpop.f32.mrf.mxu1 }
 0x3ba   : > { %v3751_v36 = vmul.f32 %v5438_v49, %v3639_v61  ;;  %v3637_v44 = vadd.f32 %v7217_v35, %v3465_v7  ;;  %v3476_v9 = vadd.f32 %v5001_v12, %v7158_v22  ;;  %v5440_v50 = vpop.eup %5439  ;;  %v3762_v43 = vadd.f32 %v3746_v46, %v7052_v28 }
 0x3bb   : > { %3780 = vst.msk [vmem:[%s7221_s21 + $0x38] sm:$0xff] %vm3103_vm9, %v3764_v5  ;;  %v3467_v0 = vpop.f32.mrf.mxu1 }
 0x3bc   : > { %v3767_v62 = vadd.f32 %v3751_v36, %v7082_v21  ;;  %v3749_v17 = vmul.f32 %v5440_v50, %v3637_v44  ;;  %v3640_v1 = vadd.f32 %v5019_v47, %v3476_v9  ;;  %v3468_v54 = vadd.f32 %v3467_v0, %v7160_v14  ;;  %v5442_v59 = vpop.eup %5441  ;;  %3778 = vst.msk [vmem:[%s7221_s21 + $0x28] sm:$0xff] %vm3103_vm9, %v3762_v43 }
 0x3bd   : > { %v5004_v35 = vpop.f32.mrf.mxu1 }
 0x3be   : > { %3783 = vst.msk [vmem:[%s7221_s21 + $0x50] sm:$0xff] %vm3103_vm9, %v3767_v62  ;;  %v3765_v22 = vadd.f32 %v3749_v17, %v7074_v6  ;;  %v3752_v58 = vmul.f32 %v5442_v59, %v3640_v1  ;;  %v3638_v28 = vadd.f32 %v3601_v37, %v3468_v54  ;;  %v3489_v51 = vadd.f32 %v5004_v35, %v7162_v56  ;;  %v5444_v30 = vpop.eup %5443 }
 0x3bf   : > { %v3480_v21 = vpop.f32.mrf.mxu1 }
 0x3c0   : > { %3781 = vst.msk [vmem:[%s7221_s21 + $0x40] sm:$0xff] %vm3103_vm9, %v3765_v22  ;;  %v3768_v14 = vadd.f32 %v3752_v58, %v7079_v52  ;;  %v3750_v47 = vmul.f32 %v5444_v30, %v3638_v28  ;;  %v3643_v18 = vadd.f32 %v5022_v29, %v3489_v51  ;;  %v3481_v63 = vadd.f32 %v3480_v21, %v7164_v32  ;;  %v5446_v26 = vpop.eup %5445 }
 0x3c1   : > { %v5005_v39 = vpop.f32.mrf.mxu1 }
 0x3c2   : > { %3784 = vst.msk [vmem:[%s7221_s21 + $0x58] sm:$0xff] %vm3103_vm9, %v3768_v14  ;;  %v3766_v6 = vadd.f32 %v3750_v47, %v7071_v45  ;;  %v3755_v56 = vmul.f32 %v5446_v26, %v3643_v18  ;;  %v3641_v27 = vadd.f32 %v3614_v25, %v3481_v63  ;;  %v3492_v31 = vadd.f32 %v5005_v39, %v7166_v53  ;;  %v5448_v57 = vpop.eup %5447 }
 0x3c3   : > { %v3483_v20 = vpop.f32.mrf.mxu1 }
 0x3c4   : > { %3782 = vst.msk [vmem:[%s7221_s21 + $0x48] sm:$0xff] %vm3103_vm9, %v3766_v6  ;;  %v3771_v52 = vadd.f32 %v3755_v56, %v7100_v34  ;;  %v3753_v32 = vmul.f32 %v5448_v57, %v3641_v27  ;;  %v3644_v33 = vadd.f32 %v5023_v19, %v3492_v31  ;;  %v3484_v40 = vadd.f32 %v3483_v20, %v7173_v23  ;;  %v5450_v8 = vpop.eup %5449 }
 0x3c5   : > { %v5452_v48 = vpop.eup %5451 }
 0x3c6   : > { %3787 = vst.msk [vmem:[%s7221_s21 + $0x70] sm:$0xff] %vm3103_vm9, %v3771_v52  ;;  %v3769_v45 = vadd.f32 %v3753_v32, %v7091_v15  ;;  %v3756_v37 = vmul.f32 %v5450_v8, %v3644_v33  ;;  %v3642_v53 = vadd.f32 %v3617_v2, %v3484_v40 }
 0x3c8   : > { %3785 = vst.msk [vmem:[%s7221_s21 + $0x60] sm:$0xff] %vm3103_vm9, %v3769_v45  ;;  %v3772_v4 = vadd.f32 %v3756_v37, %v7097_v41  ;;  %v3754_v38 = vmul.f32 %v5452_v48, %v3642_v53  ;;  %3795 = sbr.rel (!%p5769_p5) target bundleno = 1014 (0x3f6), region = 196 }
 0x3ca   : > { %3788 = vst.msk [vmem:[%s7221_s21 + $0x78] sm:$0xff] %vm3103_vm9, %v3772_v4  ;;  %v3770_v34 = vadd.f32 %v3754_v38, %v7088_v16 }
 0x3cc   : > { %3786 = vst.msk [vmem:[%s7221_s21 + $0x68] sm:$0xff] %vm3103_vm9, %v3770_v34 }
 0x3cd   : > { %s7591_s16 = smov (!%p3798_p0, %s3797_s16), 16 }
 0x3ce   : > { %s4505_s23 = sshll.u32 %s7591_s16, 7 }
 0x3cf   : > { %p4508_p1 = scmp.eq.s32.totalorder %s4505_s23, 0 }
 0x3d0   : > { %s7302_s13 = sshrl.u32 (!%p4508_p1), %s7591_s16, 4 }
 0x3d1   : > { %3806 = sbr.rel (%p4508_p1) target bundleno = 1014 (0x3f6), region = 200  ;;  %p4509_p5 = scmp.le.s32.totalorder (!%p4508_p1), %s7302_s13, 0 }
 0x3d6   : > { %4165 = sbr.rel (%p4509_p5) target bundleno = 997 (0x3e5), region = 370  ;;  %s7571_s24 = smov (!%p4509_p5), %s7296_s29 }
 0x3d7   : > { %s7572_s30 = smov (!%p4509_p5), %s7221_s21  ;;  %s7311_s26 = smov (!%p4509_p5), 0  }
 0x3d8   : > { %s7313_s18 = smov (!%p4509_p5), 0  }
 0x3db LB: >> { %v3899_v16 = vld [vmem:[%s5643_s30] sm:$0xff]  ;;  %v3901_v15 = vld [vmem:[%s5643_s30 + $0x8] sm:$0xff]  ;;  %v3903_v41 = vld [vmem:[%s5643_s30 + $0x10] sm:$0xff]  ;;  %s3931_s15 = sadd.s32 1, %s5647_s26  ;;  %s3893_s18 = sadd.s32 1, %s5651_s18   ;;  %s5651_s18 = sphi %s7313_s18, %s3893_s18   ;;  %s5647_s26 = sphi %s7311_s26, %s7573_s26   ;;  %s5643_s30 = sphi %s7572_s30, %s3936_s30   ;;  %s5639_s24 = sphi %s7571_s24, %s3937_s24  }
 0x3dc   : >> { %3900 = vst [vmem:[%s5639_s24] sm:$0xff] %v3899_v16  ;;  %3902 = vst [vmem:[%s5639_s24 + $0x8] sm:$0xff] %v3901_v15  ;;  %v3905_v23 = vld [vmem:[%s5643_s30 + $0x18] sm:$0xff]  ;;  %v3907_v55 = vld [vmem:[%s5643_s30 + $0x20] sm:$0xff]  ;;  %p3932_p2 = scmp.ge.s32.totalorder %s3931_s15, %s7302_s13  ;;  %p3892_p3 = scmp.ge.s32.totalorder %s3893_s18, %s7302_s13 }
 0x3dd   : >> { %3904 = vst [vmem:[%s5639_s24 + $0x10] sm:$0xff] %v3903_v41  ;;  %v3909_v11 = vld [vmem:[%s5643_s30 + $0x28] sm:$0xff]  ;;  %3906 = vst [vmem:[%s5639_s24 + $0x18] sm:$0xff] %v3905_v23  ;;  %v3911_v13 = vld [vmem:[%s5643_s30 + $0x30] sm:$0xff] }
 0x3de   : >> { %3908 = vst [vmem:[%s5639_s24 + $0x20] sm:$0xff] %v3907_v55  ;;  %3910 = vst [vmem:[%s5639_s24 + $0x28] sm:$0xff] %v3909_v11  ;;  %v3913_v42 = vld [vmem:[%s5643_s30 + $0x38] sm:$0xff]  ;;  %v3915_v10 = vld [vmem:[%s5643_s30 + $0x40] sm:$0xff]  ;;  %s7593_s15 = smov (%p3932_p2, %s3931_s15), 0 }
 0x3df   : >> { %3912 = vst [vmem:[%s5639_s24 + $0x30] sm:$0xff] %v3911_v13  ;;  %3914 = vst [vmem:[%s5639_s24 + $0x38] sm:$0xff] %v3913_v42  ;;  %v3917_v24 = vld [vmem:[%s5643_s30 + $0x48] sm:$0xff]  ;;  %v3919_v60 = vld [vmem:[%s5643_s30 + $0x50] sm:$0xff]  ;;  %s4510_s1 = sshll.u32 %s7593_s15, 7  ;;  %s7573_s26 = smov %s7593_s15 }
 0x3e0   : >> { %3916 = vst [vmem:[%s5639_s24 + $0x40] sm:$0xff] %v3915_v10  ;;  %v3921_v3 = vld [vmem:[%s5643_s30 + $0x58] sm:$0xff]  ;;  %3918 = vst [vmem:[%s5639_s24 + $0x48] sm:$0xff] %v3917_v24  ;;  %v3923_v61 = vld [vmem:[%s5643_s30 + $0x60] sm:$0xff]  ;;  %3895 = sbr.rel (!%p3892_p3) target bundleno = 987 (0x3db), region = 376 }
 0x3e1   : >> { %3920 = vst [vmem:[%s5639_s24 + $0x50] sm:$0xff] %v3919_v60  ;;  %3922 = vst [vmem:[%s5639_s24 + $0x58] sm:$0xff] %v3921_v3  ;;  %v3925_v7 = vld [vmem:[%s5643_s30 + $0x68] sm:$0xff]  ;;  %v3927_v49 = vld [vmem:[%s5643_s30 + $0x70] sm:$0xff] }
 0x3e2   : >> { %3924 = vst [vmem:[%s5639_s24 + $0x60] sm:$0xff] %v3923_v61  ;;  %3926 = vst [vmem:[%s5639_s24 + $0x68] sm:$0xff] %v3925_v7  ;;  %v3929_v29 = vld [vmem:[%s5643_s30 + $0x78] sm:$0xff]  ;;  %s3936_s30 = scalar_lea.vmem %s7221_s21, %s4510_s1 [#allocation4]  }
 0x3e3   : >> { %3928 = vst [vmem:[%s5639_s24 + $0x70] sm:$0xff] %v3927_v49  ;;  %3930 = vst [vmem:[%s5639_s24 + $0x78] sm:$0xff] %v3929_v29  ;;  %s3937_s24 = scalar_lea.vmem %s7296_s29, %s4510_s1  }
 0x3e5 PF: > { %s7371_s20 = sand.u32 15, %s7591_s16   ;;  %s4527_s27 = sshll.u32 %s7302_s13, 7 }
 0x3e6   : > { %s3942_s17 = scalar_lea.vmem %s7221_s21, %s4527_s27 [#allocation4]   ;;  %s3944_s28 = scalar_lea.vmem %s7296_s29, %s4527_s27  }
 0x3e7   : > { %p4515_p4 = scmp.le.s32.totalorder %s7371_s20, 0 }
 0x3e8   : > { %s5653_s19 = smov (!%p4515_p4), %s3944_s28   ;;  %s5657_s14 = smov (!%p4515_p4), %s3942_s17  }
 0x3e9   : > { %4179 = sbr.rel (%p4515_p4) target bundleno = 1014 (0x3f6), region = 381  ;;  %s5661_s25 = smov (!%p4515_p4), 0  }
 0x3ea   : > { %s5665_s23 = smov (!%p4515_p4), 0  }
 0x3ee LB: >> { %v3954_v5 = vld [vmem:[%s5659_s14] sm:$0xff]  ;;  %s3956_s16 = sadd.s32 1, %s5663_s25  ;;  %s3948_s23 = sadd.s32 1, %s5667_s23   ;;  %s5667_s23 = sphi %s5665_s23, %s3948_s23   ;;  %s5663_s25 = sphi %s5661_s25, %s5662_s25   ;;  %s5659_s14 = sphi %s5657_s14, %s3961_s14   ;;  %s5655_s19 = sphi %s5653_s19, %s3962_s19  }
 0x3ef   : >> { %3955 = vst [vmem:[%s5655_s19] sm:$0xff] %v3954_v5  ;;  %p3957_p6 = scmp.ge.s32.totalorder %s3956_s16, %s7371_s20  ;;  %p3947_p7 = scmp.ge.s32.totalorder %s3948_s23, %s7371_s20 }
 0x3f1   : >> { %s7595_s16 = smov (%p3957_p6, %s3956_s16), 0  ;;  %3950 = sbr.rel (!%p3947_p7) target bundleno = 1006 (0x3ee), region = 387 }
 0x3f2   : >> { %s4516_s21 = sshll.u32 %s7595_s16, 3  ;;  %s5662_s25 = smov %s7595_s16  }
 0x3f3   : >> { %s3961_s14 = scalar_lea.vmem %s3942_s17, %s4516_s21 [#allocation4]   ;;  %s3962_s19 = scalar_lea.vmem %s3944_s28, %s4516_s21  }
 0x3f6 PF: > { %s7574_s23 = sld [smem:[#allocation5_spill]]  ;;  %s7576_s21 = smov %s5567_s22 }
 0x3f7   : > { %s7575_s29 = sld [smem:[#allocation6_spill]] }
 0x3fc   : > { %p19_p8 = scmp.ge.s32.totalorder %s7574_s23, 4  }
 0x3fd   : > { %s7577_s22 = smov %s7575_s29 }
 0x3fe   :  { %21 = sbr.rel (!%p19_p8) target bundleno = 4 (0x4), region = 398 }

</bundles_post_ra>
